<compile_context>
chip_gen: v5e
topology: v5e:2x2
jax: 0.10.0
libtpu: 0.0.40
codegen_flags: <defaults>
</compile_context>

<pallas_src>
import numpy as np
import jax
import jax.numpy as jnp
from jax.experimental import pallas as pl
from jax.experimental.pallas import tpu as pltpu


def _vmem_limit_bytes():
    """Generation-aware scoped-VMEM limit (~3/4 of capacity, capped at 100 MiB)."""
    try:
        cap = int(pltpu.get_tpu_info().vmem_capacity_bytes)
    except Exception:
        return None                       # query unavailable -> compiler default
    return min(cap * 3 // 4, 100 * 1024 * 1024)


def _make_voge_kernel(Cp, Co):
    c_or0 = 2 + Cp          # first orientation channel in the fused table
    c_ft0 = 2 + Cp + Co     # first feature channel in the fused table

    def kernel(idx_ref, wgt_ref, attr_ref, out_ref, vis_ref):
        idx = idx_ref[0]                  # [K, TP] int32   (-1 == empty slot)
        wgt = wgt_ref[0]                  # [K, TP] f32     (blending weights)
        attr_t = attr_ref[...]            # [Ca, Pp] fused table, transposed,
                                          # zero padded, pre-cast (matmul dtype)
        K, TP = idx.shape
        Ca, Pp = attr_t.shape

        # Weighted one-hot selection matrix, transposed (vertices on sublanes,
        # pixels on lanes), built one fragment slot at a time:
        #   wsel_t[v, pix] = sum_k wgt[k, pix] * (idx[k, pix] == v)
        # Empty slots (idx == -1) never match any v >= 0, so no pre-masking.
        vid = jax.lax.broadcasted_iota(jnp.int32, (Pp, TP), 0)
        eq0 = idx[0:1, :] == vid          # slot-0 match, reused for mask & vis
        wsel_t = jnp.where(eq0, wgt[0:1, :], 0.0)
        for k in range(1, K):             # K is small & static -> unrolled
            wsel_t = wsel_t + jnp.where(idx[k:k + 1, :] == vid,
                                        wgt[k:k + 1, :], 0.0)

        # interpolate_attr over the fused table in ONE MXU matmul
        # ([Ca, Pp] @ [Pp, TP], f32 accumulation). Result is channel-major.
        interp = jnp.dot(attr_t, wsel_t.astype(attr_t.dtype),
                         preferred_element_type=jnp.float32)   # [Ca, TP]

        chan = jax.lax.broadcasted_iota(jnp.int32, (Ca, TP), 0)
        is_orient = (chan >= c_or0) & (chan < c_ft0)
        is_feat = chan >= c_ft0

        # softmax over orientation channels (sublane-masked; EUP exp + recip)
        o_max = jnp.max(jnp.where(is_orient, interp, -1e30),
                        axis=0, keepdims=True)
        e = jnp.where(is_orient, jnp.exp(interp - o_max), 0.0)
        porient = e * pl.reciprocal(jnp.sum(e, axis=0, keepdims=True),
                                    approx=True)

        # L2-normalize feature channels (matches F.normalize eps=1e-12)
        sumsq = jnp.sum(jnp.where(is_feat, interp * interp, 0.0),
                        axis=0, keepdims=True)
        pfeat = interp * jax.lax.rsqrt(jnp.maximum(sumsq, 1e-24))

        # mask = (pix_to_kernel[..., 0] != -1)
        maskval = (idx[0:1, :] != -1).astype(jnp.float32)

        # single lane-dense channel-major store:
        # rows = [mask | sil | part | orient(softmax) | feat(L2)]
        out_ref[0] = jnp.where(chan == 0, maskval,
                     jnp.where(is_orient, porient,
                     jnp.where(is_feat, pfeat, interp))).astype(out_ref.dtype)

        # per-tile vertex-visibility partial (slot 0 only, matching the
        # reference torch.unique over pix_to_kernel[..., 0]); OR-ed outside.
        vis_ref[0, 0] = jnp.max(jnp.where(eq0, 1.0, 0.0),
                                axis=1, keepdims=True).astype(jnp.int32)

    return kernel


def voge_raster_outputs(vert_index_kmaj, vert_weight_kmaj, attr_t, *, Cp, Co, D,
                        tile=1024, out_dtype=jnp.bfloat16):
    """Runs the Pallas kernel on K-major fragments and a transposed table.

    Args:
      vert_index_kmaj:  [N, K, HW] int32 fragment vertex ids (-1 == empty).
      vert_weight_kmaj: [N, K, HW] f32 blending weights.
      attr_t:           [Ca, Pp] fused attribute table (already matmul dtype).

    Returns:
      out:      [N, Ca, HW] channel-major [mask | sil | part | orient | feat].
      vis_part: [N, nt, Pp, 1] per-tile visibility partials (int32).
    """
    N, K, HW = vert_index_kmaj.shape
    Ca, Pp = attr_t.shape
    assert Ca == 2 + Cp + Co + D
    assert Pp % 128 == 0

    tile = min(tile, HW)                 # cap tile for small images
    assert HW % tile == 0 and (tile % 128 == 0 or tile == HW)
    nt = HW // tile

    kernel = _make_voge_kernel(Cp, Co)

    frag_spec = pl.BlockSpec((1, K, tile), lambda n, t: (n, 0, t))
    out_shape = (
        jax.ShapeDtypeStruct((N, Ca, HW), out_dtype),      # fused per-pixel block
        jax.ShapeDtypeStruct((N, nt, Pp, 1), jnp.int32),   # visibility partials
    )

    cost = pl.CostEstimate(
        flops=2 * N * HW * Pp * Ca + 16 * N * HW * Ca,
        transcendentals=N * HW * (Co + 2),
        bytes_accessed=(vert_index_kmaj.size * 4 + vert_weight_kmaj.size * 4
                        + N * nt * attr_t.size * np.dtype(attr_t.dtype).itemsize
                        + N * HW * Ca * np.dtype(out_dtype).itemsize
                        + N * nt * Pp * 4))

    return pl.pallas_call(
        kernel,
        out_shape=out_shape,
        grid_spec=pltpu.PrefetchScalarGridSpec(
            num_scalar_prefetch=0,
            grid=(N, nt),
            in_specs=[frag_spec, frag_spec,
                      # constant index_map -> fetched once, stays resident
                      pl.BlockSpec((Ca, Pp), lambda n, t: (0, 0))],
            out_specs=[pl.BlockSpec((1, Ca, tile), lambda n, t: (n, 0, t)),
                       pl.BlockSpec((1, 1, Pp, 1), lambda n, t: (n, t, 0, 0))],
        ),
        compiler_params=pltpu.CompilerParams(
            dimension_semantics=("parallel", "parallel"),
            vmem_limit_bytes=_vmem_limit_bytes()),
        cost_estimate=cost,
    )(vert_index_kmaj, vert_weight_kmaj, attr_t)


def neural_mesh_model_voge_forward(verts, vert_index, vert_weight, features,
                                   vert_part, vert_orient_weights, H, W, *,
                                   tile=1024, matmul_dtype=jnp.bfloat16,
                                   out_dtype=jnp.bfloat16):
    """JAX/Pallas equivalent of NeuralMeshModelVoGE.forward (off_set_mesh=False).

    Fragment indices are per-batch local (0..P-1, -1 == empty), matching the
    reference's `unique(...) - i*P` un-packing.
    """
    N, P, _ = verts.shape
    HW = H * W
    D = features.shape[-1]
    Cp = vert_part.shape[-1]
    Co = vert_orient_weights.shape[-1]

    # GaussianMeshesNaive(verts, sigmas = I*2000) feeds only the rasterizer.
    # TODO(synk): the VoGE Gaussian-splat rasterizer has no Pallas port; its
    # fragments (vert_index / vert_weight) are taken as kernel inputs instead.

    # Fused, zero-padded attribute table: [zeros | ones | part | orient | feat].
    # Row/column 0 is a placeholder the kernel overwrites with the mask; the
    # ones row yields the silhouette directly from the matmul.  P is padded to
    # a multiple of 128 so the MXU contraction dim is aligned (padded rows are
    # zero and never selected).  Transposed to [Ca, Pp] (channel-major) and
    # pre-cast to the matmul dtype so the kernel never re-casts it.
    Pp = max(128, -(-P // 128) * 128)
    attr = jnp.concatenate(
        [jnp.zeros((P, 1), jnp.float32),
         jnp.ones((P, 1), jnp.float32),
         vert_part.astype(jnp.float32),
         vert_orient_weights.astype(jnp.float32),
         features.astype(jnp.float32)], axis=-1)
    attr = jnp.pad(attr, ((0, Pp - P), (0, 0)))
    attr_t = jnp.transpose(attr).astype(matmul_dtype)            # [Ca, Pp]

    # Fragments K-major ([N, K, HW]) so the kernel's per-pixel axis is the
    # 128-wide lane axis everywhere (lane-dense loads, matmul and stores).
    idx_kmaj = jnp.transpose(vert_index, (0, 2, 1)).astype(jnp.int32)
    wgt_kmaj = jnp.transpose(vert_weight, (0, 2, 1)).astype(jnp.float32)

    out, vis_part = voge_raster_outputs(
        idx_kmaj, wgt_kmaj, attr_t, Cp=Cp, Co=Co, D=D,
        tile=tile, out_dtype=out_dtype)

    out = out.astype(jnp.float32)        # reference returns f32 maps
    c_or0, c_ft0 = 2 + Cp, 2 + Cp + Co
    mask = out[:, 0, :].reshape(N, H, W)
    sil = out[:, 1, :].reshape(N, H, W)
    ppart = out[:, 2:c_or0, :].reshape(N, Cp, H, W)
    porient = out[:, c_or0:c_ft0, :].reshape(N, Co, H, W)
    pfeat = out[:, c_ft0:, :].reshape(N, D, H, W)
    vis = jnp.max(vis_part[:, :, :P, 0], axis=1)                 # OR over tiles

    # F.interpolate(..., render_size) is nearest-neighbour; the rasterized
    # resolution equals render_size here, so the resize is the identity.
    return dict(
        mask=mask,
        mask_bp=sil,
        pixel_part=ppart,
        projected_map=pfeat,
        vert_visibility=vis,
        pixel_orient_weights=porient,
    )


if __name__ == "__main__":
    key = jax.random.PRNGKey(0)
    k1, k2, k3, k4, k5, k6 = jax.random.split(key, 6)

    N, P, K = 2, 8, 4           # batch, vertices (Gaussian kernels), kernels/pixel
    H = W = 16                  # rasterized / render size
    HW = H * W
    Cp, Co, D = 4, 3, 32        # part channels, orientation channels, feature dim

    verts = jax.random.normal(k1, (N, P, 3), jnp.float32)

    # Deterministic synthetic fragments (stand-in for the VoGE rasterizer output).
    vert_index = jax.random.randint(k2, (N, HW, K), -1, P, dtype=jnp.int32)
    vert_weight = jax.random.uniform(k3, (N, HW, K), jnp.float32)
    vert_weight = jnp.where(vert_index >= 0, vert_weight, 0.0)

    # Deterministic "parameters" (features buffer + per-vertex attributes).
    features = jax.random.normal(k4, (P, D), jnp.float32)
    vert_part = jax.random.normal(k5, (P, Cp), jnp.float32)
    vert_orient_weights = jax.random.normal(k6, (P, Co), jnp.float32)

    out = neural_mesh_model_voge_forward(
        verts, vert_index, vert_weight, features, vert_part,
        vert_orient_weights, H, W)
    jax.block_until_ready(out)

    # Pure-JAX f32 cross-check of the hot path (kernel matmul is bf16-in /
    # f32-accumulate and outputs are stored in bf16, hence loose tolerances).
    w_ref = jnp.where(vert_index >= 0, vert_weight, 0.0)
    oh = (vert_index[..., None] == jnp.arange(P)).astype(jnp.float32)   # [N,HW,K,P]
    wsel = jnp.einsum('nhk,nhkp->nhp', w_ref, oh)

    ref_part = jnp.einsum('nhp,pc->nhc', wsel, vert_part)
    ref_part = jnp.transpose(ref_part.reshape(N, H, W, Cp), (0, 3, 1, 2))
    assert np.allclose(np.asarray(out["pixel_part"]), np.asarray(ref_part),
                       atol=5e-2, rtol=2e-2), "pixel_part mismatch"

    ref_mask = (vert_index[:, :, 0] != -1).astype(jnp.float32).reshape(N, H, W)
    assert np.array_equal(np.asarray(out["mask"]), np.asarray(ref_mask)), \
        "mask mismatch"

    ref_sil = jnp.sum(w_ref, axis=-1).reshape(N, H, W)
    assert np.allclose(np.asarray(out["mask_bp"]), np.asarray(ref_sil),
                       atol=5e-2, rtol=2e-2), "mask_bp mismatch"

    ref_vis = (vert_index[:, :, 0:1] == jnp.arange(P)).any(axis=1).astype(jnp.int32)
    assert np.array_equal(np.asarray(out["vert_visibility"]),
                          np.asarray(ref_vis)), "vert_visibility mismatch"

    # softmax rows sum to ~1; projected_map is unit-norm (or exactly 0 when
    # no fragment touches the pixel).
    osum = np.asarray(out["pixel_orient_weights"]).sum(axis=1)
    assert np.allclose(osum, 1.0, atol=2e-2), "orient softmax mismatch"
    norms = np.linalg.norm(np.asarray(out["projected_map"]), axis=1)
    assert np.all((np.abs(norms - 1.0) < 2e-2) | (norms < 1e-6)), \
        "projected_map normalization mismatch"

    print("KERNEL_OK")
</pallas_src>

<mosaic_0001>
module attributes {stable_mosaic.version = 11 : i64} {
  func.func @kernel(%arg0: i32, %arg1: i32, %arg2: memref<1x4x256xi32, #tpu.memory_space<vmem>>, %arg3: memref<1x4x256xf32, #tpu.memory_space<vmem>>, %arg4: memref<41x128xbf16, #tpu.memory_space<vmem>>, %arg5: memref<1x41x256xbf16, #tpu.memory_space<vmem>>, %arg6: memref<1x1x128x1xi32, #tpu.memory_space<vmem>>) attributes {dimension_semantics = [#tpu.dimension_semantics<parallel>, #tpu.dimension_semantics<parallel>], iteration_bounds = array<i64: 2, 1>, scalar_prefetch = 0 : i64, scratch_operands = 0 : i64, tpu.core_type = #tpu.core_type<tc>, window_params = [{transform_indices = @transform_0, window_bounds = array<i64: 1, 4, 256>}, {transform_indices = @transform_1, window_bounds = array<i64: 1, 4, 256>}, {pipeline_mode = #tpu.pipeline_mode<synchronous>, transform_indices = @transform_2, window_bounds = array<i64: 41, 128>}, {transform_indices = @transform_3, window_bounds = array<i64: 1, 41, 256>}, {transform_indices = @transform_4, window_bounds = array<i64: 1, 1, 128, 1>}]} {
    %c0 = arith.constant 0 : index
    %c0_0 = arith.constant 0 : index
    %c0_1 = arith.constant 0 : index
    %0 = vector.load %arg2[%c0, %c0_0, %c0_1] : memref<1x4x256xi32, #tpu.memory_space<vmem>>, vector<1x4x256xi32>
    %1 = vector.shape_cast %0 : vector<1x4x256xi32> to vector<4x256xi32>
    %c0_2 = arith.constant 0 : index
    %c0_3 = arith.constant 0 : index
    %c0_4 = arith.constant 0 : index
    %2 = vector.load %arg3[%c0_2, %c0_3, %c0_4] : memref<1x4x256xf32, #tpu.memory_space<vmem>>, vector<1x4x256xf32>
    %3 = vector.shape_cast %2 : vector<1x4x256xf32> to vector<4x256xf32>
    %c0_5 = arith.constant 0 : index
    %c0_6 = arith.constant 0 : index
    %4 = vector.load %arg4[%c0_5, %c0_6] : memref<41x128xbf16, #tpu.memory_space<vmem>>, vector<41x128xbf16>
    %5 = tpu.iota {dimensions = array<i32: 0>} : vector<128x256xi32>
    %6 = vector.extract_strided_slice %1 {offsets = [0, 0], sizes = [1, 256], strides = [1, 1]} : vector<4x256xi32> to vector<1x256xi32>
    %7 = vector.broadcast %6 : vector<1x256xi32> to vector<128x256xi32>
    %8 = arith.cmpi eq, %7, %5 : vector<128x256xi32>
    %9 = vector.extract_strided_slice %3 {offsets = [0, 0], sizes = [1, 256], strides = [1, 1]} : vector<4x256xf32> to vector<1x256xf32>
    %cst = arith.constant 0.000000e+00 : f32
    %10 = vector.shape_cast %9 : vector<1x256xf32> to vector<1x256xf32>
    %11 = vector.broadcast %10 : vector<1x256xf32> to vector<128x256xf32>
    %12 = vector.broadcast %cst : f32 to vector<128x256xf32>
    %13 = arith.select %8, %11, %12 : vector<128x256xi1>, vector<128x256xf32>
    %14 = vector.extract_strided_slice %1 {offsets = [1, 0], sizes = [1, 256], strides = [1, 1]} : vector<4x256xi32> to vector<1x256xi32>
    %15 = vector.broadcast %14 : vector<1x256xi32> to vector<128x256xi32>
    %16 = arith.cmpi eq, %15, %5 : vector<128x256xi32>
    %17 = vector.extract_strided_slice %3 {offsets = [1, 0], sizes = [1, 256], strides = [1, 1]} : vector<4x256xf32> to vector<1x256xf32>
    %cst_7 = arith.constant 0.000000e+00 : f32
    %18 = vector.shape_cast %17 : vector<1x256xf32> to vector<1x256xf32>
    %19 = vector.broadcast %18 : vector<1x256xf32> to vector<128x256xf32>
    %20 = vector.broadcast %cst_7 : f32 to vector<128x256xf32>
    %21 = arith.select %16, %19, %20 : vector<128x256xi1>, vector<128x256xf32>
    %22 = arith.addf %13, %21 : vector<128x256xf32>
    %23 = vector.extract_strided_slice %1 {offsets = [2, 0], sizes = [1, 256], strides = [1, 1]} : vector<4x256xi32> to vector<1x256xi32>
    %24 = vector.broadcast %23 : vector<1x256xi32> to vector<128x256xi32>
    %25 = arith.cmpi eq, %24, %5 : vector<128x256xi32>
    %26 = vector.extract_strided_slice %3 {offsets = [2, 0], sizes = [1, 256], strides = [1, 1]} : vector<4x256xf32> to vector<1x256xf32>
    %cst_8 = arith.constant 0.000000e+00 : f32
    %27 = vector.shape_cast %26 : vector<1x256xf32> to vector<1x256xf32>
    %28 = vector.broadcast %27 : vector<1x256xf32> to vector<128x256xf32>
    %29 = vector.broadcast %cst_8 : f32 to vector<128x256xf32>
    %30 = arith.select %25, %28, %29 : vector<128x256xi1>, vector<128x256xf32>
    %31 = arith.addf %22, %30 : vector<128x256xf32>
    %32 = vector.extract_strided_slice %1 {offsets = [3, 0], sizes = [1, 256], strides = [1, 1]} : vector<4x256xi32> to vector<1x256xi32>
    %33 = vector.broadcast %32 : vector<1x256xi32> to vector<128x256xi32>
    %34 = arith.cmpi eq, %33, %5 : vector<128x256xi32>
    %35 = vector.extract_strided_slice %3 {offsets = [3, 0], sizes = [1, 256], strides = [1, 1]} : vector<4x256xf32> to vector<1x256xf32>
    %cst_9 = arith.constant 0.000000e+00 : f32
    %36 = vector.shape_cast %35 : vector<1x256xf32> to vector<1x256xf32>
    %37 = vector.broadcast %36 : vector<1x256xf32> to vector<128x256xf32>
    %38 = vector.broadcast %cst_9 : f32 to vector<128x256xf32>
    %39 = arith.select %34, %37, %38 : vector<128x256xi1>, vector<128x256xf32>
    %40 = arith.addf %31, %39 : vector<128x256xf32>
    %41 = arith.truncf %40 : vector<128x256xf32> to vector<128x256xbf16>
    %cst_10 = arith.constant dense<0.000000e+00> : vector<41x256xf32>
    %42 = tpu.matmul %4, %41, %cst_10 {dimension_numbers = #tpu.dot_dimension_numbers<[1], [0], [0], [1], [0, 0, 1, 1], [], []>} : vector<41x128xbf16>, vector<128x256xbf16>, vector<41x256xf32> -> vector<41x256xf32>
    %43 = tpu.iota {dimensions = array<i32: 0>} : vector<41x256xi32>
    %c6_i32 = arith.constant 6 : i32
    %44 = vector.broadcast %c6_i32 : i32 to vector<41x256xi32>
    %45 = arith.cmpi sge, %43, %44 : vector<41x256xi32>
    %c9_i32 = arith.constant 9 : i32
    %46 = vector.broadcast %c9_i32 : i32 to vector<41x256xi32>
    %47 = arith.cmpi slt, %43, %46 : vector<41x256xi32>
    %48 = arith.andi %45, %47 : vector<41x256xi1>
    %c9_i32_11 = arith.constant 9 : i32
    %49 = vector.broadcast %c9_i32_11 : i32 to vector<41x256xi32>
    %50 = arith.cmpi sge, %43, %49 : vector<41x256xi32>
    %cst_12 = arith.constant -1.000000e+30 : f32
    %51 = vector.broadcast %cst_12 : f32 to vector<41x256xf32>
    %52 = arith.select %48, %42, %51 : vector<41x256xi1>, vector<41x256xf32>
    %cst_13 = arith.constant dense<0xFF800000> : vector<256xf32>
    %53 = vector.multi_reduction <maximumf>, %52, %cst_13 [0] : vector<41x256xf32> to vector<256xf32>
    %54 = vector.shape_cast %53 : vector<256xf32> to vector<1x256xf32>
    %55 = vector.broadcast %54 : vector<1x256xf32> to vector<41x256xf32>
    %56 = arith.subf %42, %55 : vector<41x256xf32>
    %57 = math.exp %56 : vector<41x256xf32>
    %cst_14 = arith.constant 0.000000e+00 : f32
    %58 = vector.broadcast %cst_14 : f32 to vector<41x256xf32>
    %59 = arith.select %48, %57, %58 : vector<41x256xi1>, vector<41x256xf32>
    %cst_15 = arith.constant dense<0.000000e+00> : vector<256xf32>
    %60 = vector.multi_reduction <add>, %59, %cst_15 [0] : vector<41x256xf32> to vector<256xf32>
    %61 = vector.shape_cast %60 : vector<256xf32> to vector<1x256xf32>
    %62 = tpu.reciprocal %61 {approx = true} : vector<1x256xf32> -> vector<1x256xf32>
    %63 = vector.broadcast %62 : vector<1x256xf32> to vector<41x256xf32>
    %64 = arith.mulf %59, %63 : vector<41x256xf32>
    %65 = arith.mulf %42, %42 : vector<41x256xf32>
    %cst_16 = arith.constant 0.000000e+00 : f32
    %66 = vector.broadcast %cst_16 : f32 to vector<41x256xf32>
    %67 = arith.select %50, %65, %66 : vector<41x256xi1>, vector<41x256xf32>
    %cst_17 = arith.constant dense<0.000000e+00> : vector<256xf32>
    %68 = vector.multi_reduction <add>, %67, %cst_17 [0] : vector<41x256xf32> to vector<256xf32>
    %69 = vector.shape_cast %68 : vector<256xf32> to vector<1x256xf32>
    %cst_18 = arith.constant 1.000000e-24 : f32
    %70 = vector.broadcast %cst_18 : f32 to vector<1x256xf32>
    %71 = arith.maximumf %69, %70 : vector<1x256xf32>
    %72 = math.rsqrt %71 : vector<1x256xf32>
    %73 = vector.broadcast %72 : vector<1x256xf32> to vector<41x256xf32>
    %74 = arith.mulf %42, %73 : vector<41x256xf32>
    %75 = vector.extract_strided_slice %1 {offsets = [0, 0], sizes = [1, 256], strides = [1, 1]} : vector<4x256xi32> to vector<1x256xi32>
    %c-1_i32 = arith.constant -1 : i32
    %76 = vector.broadcast %c-1_i32 : i32 to vector<1x256xi32>
    %77 = arith.cmpi ne, %75, %76 : vector<1x256xi32>
    %78 = arith.extui %77 : vector<1x256xi1> to vector<1x256xi32>
    %79 = arith.sitofp %78 : vector<1x256xi32> to vector<1x256xf32>
    %c0_i32 = arith.constant 0 : i32
    %80 = vector.broadcast %c0_i32 : i32 to vector<41x256xi32>
    %81 = arith.cmpi eq, %43, %80 : vector<41x256xi32>
    %82 = arith.select %50, %74, %42 : vector<41x256xi1>, vector<41x256xf32>
    %83 = arith.select %48, %64, %82 : vector<41x256xi1>, vector<41x256xf32>
    %84 = vector.shape_cast %79 : vector<1x256xf32> to vector<1x256xf32>
    %85 = vector.broadcast %84 : vector<1x256xf32> to vector<41x256xf32>
    %86 = arith.select %81, %85, %83 : vector<41x256xi1>, vector<41x256xf32>
    %87 = arith.truncf %86 : vector<41x256xf32> to vector<41x256xbf16>
    %c0_19 = arith.constant 0 : index
    %c0_20 = arith.constant 0 : index
    %c0_21 = arith.constant 0 : index
    %88 = vector.load %arg5[%c0_19, %c0_20, %c0_21] : memref<1x41x256xbf16, #tpu.memory_space<vmem>>, vector<1x41x256xbf16>
    %89 = vector.shape_cast %88 : vector<1x41x256xbf16> to vector<41x256xbf16>
    %90 = vector.shape_cast %87 : vector<41x256xbf16> to vector<1x41x256xbf16>
    tpu.vector_store %arg5[%c0_19, %c0_20, %c0_21], %90 {strides = array<i32>} : memref<1x41x256xbf16, #tpu.memory_space<vmem>>, vector<1x41x256xbf16>,
    %cst_22 = arith.constant 1.000000e+00 : f32
    %cst_23 = arith.constant 0.000000e+00 : f32
    %91 = vector.broadcast %cst_22 : f32 to vector<128x256xf32>
    %92 = vector.broadcast %cst_23 : f32 to vector<128x256xf32>
    %93 = arith.select %8, %91, %92 : vector<128x256xi1>, vector<128x256xf32>
    %cst_24 = arith.constant dense<0xFF800000> : vector<128xf32>
    %94 = vector.multi_reduction <maximumf>, %93, %cst_24 [1] : vector<128x256xf32> to vector<128xf32>
    %95 = vector.shape_cast %94 : vector<128xf32> to vector<128x1xf32>
    %96 = arith.fptosi %95 : vector<128x1xf32> to vector<128x1xi32>
    %c0_25 = arith.constant 0 : index
    %c0_26 = arith.constant 0 : index
    %c0_27 = arith.constant 0 : index
    %c0_28 = arith.constant 0 : index
    %97 = vector.load %arg6[%c0_25, %c0_26, %c0_27, %c0_28] : memref<1x1x128x1xi32, #tpu.memory_space<vmem>>, vector<1x1x128x1xi32>
    %98 = vector.shape_cast %97 : vector<1x1x128x1xi32> to vector<128x1xi32>
    %99 = vector.shape_cast %96 : vector<128x1xi32> to vector<1x1x128x1xi32>
    tpu.vector_store %arg6[%c0_25, %c0_26, %c0_27, %c0_28], %99 {strides = array<i32>} : memref<1x1x128x1xi32, #tpu.memory_space<vmem>>, vector<1x1x128x1xi32>,
    return
  }
  func.func @transform_0(%arg0: i32, %arg1: i32) -> (i32, i32, i32) {
    %c0_i32 = arith.constant 0 : i32
    %c0_i32_0 = arith.constant 0 : i32
    return %arg0, %c0_i32, %arg1 : i32, i32, i32
  }
  func.func @transform_1(%arg0: i32, %arg1: i32) -> (i32, i32, i32) {
    %c0_i32 = arith.constant 0 : i32
    %c0_i32_0 = arith.constant 0 : i32
    return %arg0, %c0_i32, %arg1 : i32, i32, i32
  }
  func.func @transform_2(%arg0: i32, %arg1: i32) -> (i32, i32) {
    %c0_i32 = arith.constant 0 : i32
    %c0_i32_0 = arith.constant 0 : i32
    %c0_i32_1 = arith.constant 0 : i32
    return %c0_i32, %c0_i32_0 : i32, i32
  }
  func.func @transform_3(%arg0: i32, %arg1: i32) -> (i32, i32, i32) {
    %c0_i32 = arith.constant 0 : i32
    %c0_i32_0 = arith.constant 0 : i32
    return %arg0, %c0_i32, %arg1 : i32, i32, i32
  }
  func.func @transform_4(%arg0: i32, %arg1: i32) -> (i32, i32, i32, i32) {
    %c0_i32 = arith.constant 0 : i32
    %c0_i32_0 = arith.constant 0 : i32
    %c0_i32_1 = arith.constant 0 : i32
    return %arg0, %arg1, %c0_i32, %c0_i32_0 : i32, i32, i32, i32
  }
}

</mosaic_0001>

<bundles_post_ra>
// kernel: tpu_custom_call.1
= control target key start
LH: loop header
LB: loop body
LE: loop exit
PB: predicated region body
PF: predicated region fallthrough
CT: control target
= control target key end

     0   :  { %s2864_s0 = inlined_call_operand.hbm [shape: s32[2,4,256], index: 0, kind: input, shape index: {}]   ;;  %s2865_s1 = inlined_call_operand.hbm [shape: f32[2,4,256], index: 1, kind: input, shape index: {}]   ;;  %s2866_s2 = inlined_call_operand.hbm [shape: bf16[41,128], index: 2, kind: input, shape index: {}]   ;;  %s2867_s3 = inlined_call_operand.vmem [shape: bf16[2,41,256], index: 3, kind: output, shape index: {0}]   ;;  %s2868_s4 = inlined_call_operand.vmem [shape: s32[2,1,128,1], index: 4, kind: output, shape index: {1}]  }
   0x1   :  { %2892 = sst [smem:[#allocation11_spill]] %s2866_s2 }
   0x2   :  { %10 = vsyncpa [#allocation3], 0 }
   0x3   :  { %12 = vsyncpa [#allocation3 + $0x1], 0 }
   0x4   :  { %13 = vsyncpa [#allocation5], 0 }
   0x5   :  { %15 = vsyncpa [#allocation5 + $0x1], 0  ;;  %s1836_s15 = smov 0   ;;  %s1838_s16 = smov 0  }
   0x6   :  { %s1840_s17 = smov 0   ;;  %s1842_s18 = smov 0  }
   0x7   :  { %s1844_s19 = smov 0   ;;  %s1846_s20 = smov 0  }
   0x8 LB: > { %s2869_s21 = sadd.s32 4294967295, %s1804_s20   ;;  %p1430_p0 = scmp.ge.s32.totalorder %s1804_s20, 1  ;;  %s1804_s20 = sphi %s1846_s20, %s21_s20   ;;  %s1800_s19 = sphi %s1844_s19, %s2930_s19   ;;  %s1796_s18 = sphi %s1842_s18, %s2929_s18   ;;  %s1792_s17 = sphi %s1840_s17, %s2928_s17   ;;  %s1788_s16 = sphi %s1838_s16, %s2927_s16   ;;  %s1784_s15 = sphi %s1836_s15, %s2926_s15  }
   0x9   : > { %p1870_p1 = scmp.eq.s32.totalorder %s2869_s21, 0  ;;  %p171_p2 = scmp.lt.s32.totalorder %s1804_s20, 3 }
   0xa   : > { %s2894_s2 = sld [smem:[#allocation11_spill]]  ;;  %s1806_s27 = smov [#allocation6]  }
   0xb   : > { %p1878_p3 = pnand %p1430_p0, %p171_p2  ;;  %s184_s28 = sshll.u32 %s1806_s27, 4  ;;  %s185_s28 = int_to_ptr.vmem [resolvable:$true] %s184_s28 }
   0xc   : > { %s1807_s29 = smov 64   ;;  %s1808_s30 = smov 4  }
   0xd   : > { %p1572_p4 = pneg %p1878_p3  ;;  %s33_s5 = sadd.s32 1, %s1800_s19 }
   0xe   : > { %p35_p6 = scmp.ge.s32.totalorder %s33_s5, 2  ;;  %s42_s6 = sadd.s32 1, %s1792_s17 }
   0xf   : > { %p1573_p5 = pnand %p1572_p4, %p1870_p1  ;;  %p49_p7 = scmp.ne.s32.totalorder %s1792_s17, %s1788_s16 }
  0x10   : > { %s182_s25 = sshll.u32 %s2894_s2, 4  ;;  %p50_p8 = scmp.eq.s32.totalorder %s1804_s20, 0  ;;  %s183_s25 = int_to_ptr.hbm [resolvable:$true] %s182_s25 }
  0x11   : > { %1575 = dma.hbm_to_vmem [thread:$0]  (!%p1573_p5), %s183_s25, 384, %s185_s28, [#allocation5], %s1807_s29, %s1807_s29, %s1808_s30  }
  0x12   : > { %s2932_s5 = smov (%p35_p6, %s33_s5), 0  ;;  %p1893_p9 = por %p50_p8, %p49_p7 }
  0x13   : > { %2896 = sst [smem:[#allocation10_spill]] %s2932_s5  ;;  %p55_p10 = scmp.ne.s32.totalorder %s1788_s16, %s1784_s15 }
  0x14   : > { %s37_s8 = ssub.s32 %s1800_s19, %s2932_s5  ;;  %p1584_p11 = scmp.lt.s32.totalorder %s1804_s20, 2 }
  0x15   : > { %p40_p12 = scmp.eq.s32.totalorder %s37_s8, 0  ;;  %p1904_p13 = por %p1870_p1, %p55_p10 }
  0x16   : > { %s198_s10 = sand.u32 1, %s1792_s17   ;;  %s1461_s11 = sshll.u32 %s1800_s19, 3 }
  0x17   : > { %s1911_s12 = scalar_select %p40_p12, %s1792_s17, %s42_s6  }
  0x18   : > { %s1433_s13 = sshll.u32 %s198_s10, 3  ;;  %s209_s24 = scalar_lea.hbm %s2864_s0, %s1461_s11 }
  0x19   : > { %s211_s25 = sshll.u32 %s209_s24, 4  ;;  %s202_s15 = scalar_lea.vmem [#allocation2], %s1433_s13  ;;  %s212_s25 = int_to_ptr.hbm [resolvable:$true] %s211_s25 }
  0x1a   : > { %s213_s27 = sshll.u32 %s202_s15, 4  ;;  %p1577_p0 = pnand %p1584_p11, %p1893_p9  ;;  %s214_s27 = int_to_ptr.vmem [resolvable:$true] %s213_s27 }
  0x1b   : > { %s231_s30 = scalar_lea.hbm %s2865_s1, %s1461_s11  ;;  %s220_s8 = sand.u32 1, %s1804_s20  }
  0x1c   : > { %s199_s6 = scalar_lea.sflag [#allocation3], %s198_s10  ;;  %s233_s21 = sshll.u32 %s231_s30, 4  ;;  %s234_s21 = int_to_ptr.hbm [resolvable:$true] %s233_s21 }
  0x1d   : > { %1579 = dma.hbm_to_vmem [thread:$0]  (!%p1577_p0), %s212_s25, 128, %s214_s27, %s199_s6  }
  0x1e   : > { %s224_s2 = scalar_lea.vmem [#allocation4], %s1433_s13  ;;  %s221_s14 = scalar_lea.sflag [#allocation5], %s220_s8 }
  0x1f   : > { %s235_s5 = sshll.u32 %s224_s2, 4  ;;  %244 = sbr.rel (%p1878_p3) target bundleno = 358 (0x166), region = 32  ;;  %s236_s5 = int_to_ptr.vmem [resolvable:$true] %s235_s5 }
  0x20   : > { %1582 = dma.hbm_to_vmem [thread:$0]  (!%p1577_p0), %s234_s21, 128, %s236_s5, %s221_s14  }
  0x21   : > { %s246_s7 = sand.u32 (!%p1878_p3), 1, %s1788_s16  }
  0x22   : > { %s1927_s23 = sshll.u32 (!%p1878_p3), %s246_s7, 3  ;;  %s247_s11 = scalar_lea.sflag (!%p1878_p3), [#allocation3], %s246_s7 }
  0x23   : > { %s250_s24 = scalar_lea.vmem (!%p1878_p3), [#allocation2], %s1927_s23 }
  0x24   : > { %1771 = dma.done.wait (%p1904_p13), %s247_s11, 128  }
  0x25   : > { %1773 = vsyncadd (%p1904_p13), %s247_s11, 4294967168  ;;  %s2899_s2 = sadd.s32 4294967295, %s1804_s20   ;;  %s260_s5 = scalar_lea.vmem [#allocation4], %s1927_s23 }
  0x26   : > { %s256_s21 = sand.u32 1, %s2899_s2  }
  0x27   : > { %s257_s26 = scalar_lea.sflag [#allocation5], %s256_s21 }
  0x28   : > { %1775 = dma.done.wait (%p1904_p13), %s257_s26, 128  }
  0x29   : > { %1777 = vsyncadd (%p1904_p13), %s257_s26, 4294967168 }
  0x2a   : > { %1779 = dma.done.wait (%p1870_p1), [#allocation5], 384  }
  0x2b   : > { %1781 = vsyncadd (%p1870_p1), [#allocation5], 4294966912  ;;  %v338_v0 = vlaneseq  ;;  %v1955_v4 = vld [vmem:[%s250_s24] sm:$0xff]  ;;  %v1957_v5 = vld [vmem:[%s260_s5] sm:$0xff]  ;;  %p312_p1 = scmp.lt.s32.totalorder %s1796_s18, 1 }
  0x2c   : > { %v355_v10 = vperm.slane %v1955_v4, 0  ;;  %v392_v11 = vperm.slane %v1957_v5, 0  ;;  %v430_v12 = vperm.slane %v1955_v4, 1  ;;  %v466_v13 = vperm.slane %v1957_v5, 1 }
  0x2d   : > { %v1945_v1 = vshrl.u32 %v338_v0, 7  ;;  %v536_v14 = vperm.slane %v1955_v4, 2  ;;  %v572_v15 = vperm.slane %v1957_v5, 2  ;;  %v642_v16 = vperm.slane %v1955_v4, 3  ;;  %s2934_s18 = smov (!%p312_p1, %s1796_s18), 1 }
  0x2e   : > { %v678_v17 = vperm.slane %v1957_v5, 3  ;;  %v1979_v18 = vperm.slane %v355_v10, 0  ;;  %v1981_v19 = vperm.slane %v392_v11, 0  ;;  %v1983_v20 = vperm.slane %v430_v12, 1  ;;  %s1463_s22 = sshll.u32 %s2934_s18, 7  ;;  %s1483_s25 = smul.u32 48, %s2934_s18 }
  0x2f   : > { %v1948_v2 = vadd.s32 112, %v1945_v1  ;;  %v1951_v3 = vadd.s32 120, %v1945_v1  ;;  %v1960_v6 = vadd.s32 96, %v1945_v1  ;;  %v1963_v7 = vadd.s32 104, %v1945_v1  ;;  %s2673_s13 = scalar_lea.vmem %s2868_s4, %s1463_s22 }
  0x30   : > { %v1966_v8 = vadd.s32 80, %v1945_v1  ;;  %v1969_v9 = vadd.s32 88, %v1945_v1  ;;  %v1985_v21 = vperm.slane %v466_v13, 1  ;;  %v1987_v22 = vperm.slane %v536_v14, 2  ;;  %s319_s27 = scalar_lea.vmem %s2867_s3, %s1483_s25 }
  0x31   : > { %v1989_v23 = vperm.slane %v572_v15, 2  ;;  %v1991_v24 = vperm.slane %v642_v16, 3  ;;  %v1993_v25 = vperm.slane %v678_v17, 3  ;;  %vm2876_vm0 = vcmp.eq.s32.totalorder %v1979_v18, %v1948_v2 }
  0x32   : > { %vm2872_vm1 = vcmp.eq.s32.totalorder %v1979_v18, %v1951_v3  ;;  %vm462_vm2 = vcmp.eq.s32.totalorder %v1983_v20, %v1948_v2  ;;  %vm464_vm3 = vcmp.eq.s32.totalorder %v1983_v20, %v1951_v3  ;;  %v426_v26 = vsel %vm2876_vm0, %v1981_v19, 0.0 }
  0x33   : > { %v428_v27 = vsel %vm2872_vm1, %v1981_v19, 0.0  ;;  %v500_v28 = vsel %vm462_vm2, %v1985_v21, 0.0  ;;  %v502_v29 = vsel %vm464_vm3, %v1985_v21, 0.0  ;;  %vm568_vm4 = vcmp.eq.s32.totalorder %v1987_v22, %v1948_v2 }
  0x34   : > { %v532_v30 = vadd.f32 %v500_v28, %v426_v26  ;;  %v534_v31 = vadd.f32 %v502_v29, %v428_v27  ;;  %vm570_vm5 = vcmp.eq.s32.totalorder %v1987_v22, %v1951_v3  ;;  %v606_v32 = vsel %vm568_vm4, %v1989_v23, 0.0 }
  0x35   : > { %v608_v33 = vsel %vm570_vm5, %v1989_v23, 0.0  ;;  %vm674_vm6 = vcmp.eq.s32.totalorder %v1991_v24, %v1948_v2  ;;  %vm676_vm7 = vcmp.eq.s32.totalorder %v1991_v24, %v1951_v3  ;;  %v356_v38 = vperm.slane %v1955_v4, 4 }
  0x36   : > { %v638_v34 = vadd.f32 %v606_v32, %v532_v30  ;;  %v640_v35 = vadd.f32 %v608_v33, %v534_v31  ;;  %v712_v36 = vsel %vm674_vm6, %v1993_v25, 0.0  ;;  %v714_v37 = vsel %vm676_vm7, %v1993_v25, 0.0 }
  0x37   : > { %v393_v39 = vperm.slane %v1957_v5, 4  ;;  %v431_v40 = vperm.slane %v1955_v4, 5  ;;  %v467_v41 = vperm.slane %v1957_v5, 5  ;;  %v537_v44 = vperm.slane %v1955_v4, 6 }
  0x38   : > { %v744_v42 = vadd.f32 %v712_v36, %v638_v34  ;;  %v746_v43 = vadd.f32 %v714_v37, %v640_v35  ;;  %v573_v45 = vperm.slane %v1957_v5, 6  ;;  %v2031_v46 = vperm.slane %v356_v38, 0 }
  0x39   : > { %v2033_v47 = vperm.slane %v393_v39, 0  ;;  %v2035_v48 = vperm.slane %v431_v40, 1  ;;  %v2037_v49 = vperm.slane %v467_v41, 1  ;;  %v2039_v51 = vperm.slane %v537_v44, 2 }
  0x3a   : > { %v762_v50 = vpack.c.bf16 %v746_v43, %v744_v42  ;;  %v2041_v52 = vperm.slane %v573_v45, 2  ;;  %v643_v53 = vperm.slane %v1955_v4, 7  ;;  %vm2875_vm8 = vcmp.eq.s32.totalorder %v2031_v46, %v1948_v2 }
  0x3b   : > { %vm2871_vm9 = vcmp.eq.s32.totalorder %v2031_v46, %v1951_v3  ;;  %vm463_vm10 = vcmp.eq.s32.totalorder %v2035_v48, %v1948_v2  ;;  %vm465_vm11 = vcmp.eq.s32.totalorder %v2035_v48, %v1951_v3  ;;  %v427_v54 = vsel %vm2875_vm8, %v2033_v47, 0.0 }
  0x3c   : > { %782 = vmatpush.bf16.msra.mxu0 %v762_v50  ;;  %1467 = vmatpush.bf16.msra.mxu2 %v762_v50  ;;  %v429_v55 = vsel %vm2871_vm9, %v2033_v47, 0.0  ;;  %v501_v56 = vsel %vm463_vm10, %v2037_v49, 0.0  ;;  %v503_v57 = vsel %vm465_vm11, %v2037_v49, 0.0  ;;  %vm569_vm12 = vcmp.eq.s32.totalorder %v2039_v51, %v1948_v2 }
  0x3d   : > { %v533_v58 = vadd.f32 %v501_v56, %v427_v54  ;;  %v535_v59 = vadd.f32 %v503_v57, %v429_v55  ;;  %vm571_vm13 = vcmp.eq.s32.totalorder %v2039_v51, %v1951_v3  ;;  %v607_v60 = vsel %vm569_vm12, %v2041_v52, 0.0 }
  0x3e   : > { %v609_v61 = vsel %vm571_vm13, %v2041_v52, 0.0  ;;  %v2068_v62 = vperm.slane %v643_v53, 3  ;;  %v679_v63 = vperm.slane %v1957_v5, 7  ;;  %vm2878_vm14 = vcmp.eq.s32.totalorder %v1979_v18, %v1960_v6 }
  0x3f   : > { %v639_v0 = vadd.f32 %v607_v60, %v533_v58  ;;  %v641_v4 = vadd.f32 %v609_v61, %v535_v59  ;;  %vm2874_vm15 = vcmp.eq.s32.totalorder %v1979_v18, %v1963_v7  ;;  %v422_v5 = vsel %vm2878_vm14, %v1981_v19, 0.0 }
  0x40   : > { %vm675_vm2 = vcmp.eq.s32.totalorder %v2068_v62, %v1948_v2  ;;  %vm677_vm3 = vcmp.eq.s32.totalorder %v2068_v62, %v1951_v3  ;;  %v2079_v10 = vperm.slane %v679_v63, 3  ;;  %v424_v11 = vsel %vm2874_vm15, %v1981_v19, 0.0 }
  0x41   : > { %vm458_vm4 = vcmp.eq.s32.totalorder %v1983_v20, %v1960_v6  ;;  %vm460_vm5 = vcmp.eq.s32.totalorder %v1983_v20, %v1963_v7  ;;  %vm564_vm6 = vcmp.eq.s32.totalorder %v1987_v22, %v1960_v6  ;;  %vm566_vm7 = vcmp.eq.s32.totalorder %v1987_v22, %v1963_v7 }
  0x42   : > { %v713_v12 = vsel %vm675_vm2, %v2079_v10, 0.0  ;;  %v715_v13 = vsel %vm677_vm3, %v2079_v10, 0.0  ;;  %v496_v14 = vsel %vm458_vm4, %v1985_v21, 0.0  ;;  %v498_v15 = vsel %vm460_vm5, %v1985_v21, 0.0 }
  0x43   : > { %v745_v16 = vadd.f32 %v713_v12, %v639_v0  ;;  %v747_v17 = vadd.f32 %v715_v13, %v641_v4  ;;  %v528_v26 = vadd.f32 %v496_v14, %v422_v5  ;;  %v530_v27 = vadd.f32 %v498_v15, %v424_v11 }
  0x44   : > { %v602_v28 = vsel %vm564_vm6, %v1989_v23, 0.0  ;;  %vm670_vm10 = vcmp.eq.s32.totalorder %v1991_v24, %v1960_v6  ;;  %vm672_vm11 = vcmp.eq.s32.totalorder %v1991_v24, %v1963_v7  ;;  %v604_v30 = vsel %vm566_vm7, %v1989_v23, 0.0 }
  0x45   : > { %v763_v29 = vpack.c.bf16 %v747_v17, %v745_v16  ;;  %v634_v31 = vadd.f32 %v602_v28, %v528_v26  ;;  %v708_v32 = vsel %vm670_vm10, %v1993_v25, 0.0  ;;  %v636_v33 = vadd.f32 %v604_v30, %v530_v27 }
  0x46   : > { %v710_v34 = vsel %vm672_vm11, %v1993_v25, 0.0  ;;  %vm2877_vm12 = vcmp.eq.s32.totalorder %v2031_v46, %v1960_v6  ;;  %vm2873_vm13 = vcmp.eq.s32.totalorder %v2031_v46, %v1963_v7  ;;  %vm459_vm2 = vcmp.eq.s32.totalorder %v2035_v48, %v1960_v6 }
  0x47   : > { %806 = vmatpush.bf16.msra.mxu1 %v763_v29  ;;  %1475 = vmatpush.bf16.msra.mxu3 %v763_v29  ;;  %v740_v35 = vadd.f32 %v708_v32, %v634_v31  ;;  %v423_v36 = vsel %vm2877_vm12, %v2033_v47, 0.0  ;;  %v425_v37 = vsel %vm2873_vm13, %v2033_v47, 0.0  ;;  %v742_v38 = vadd.f32 %v710_v34, %v636_v33 }
  0x48   : > { %vm461_vm3 = vcmp.eq.s32.totalorder %v2035_v48, %v1963_v7  ;;  %v497_v39 = vsel %vm459_vm2, %v2037_v49, 0.0  ;;  %vm565_vm4 = vcmp.eq.s32.totalorder %v2039_v51, %v1960_v6  ;;  %vm567_vm5 = vcmp.eq.s32.totalorder %v2039_v51, %v1963_v7 }
  0x49   : > { %v499_v40 = vsel %vm461_vm3, %v2037_v49, 0.0  ;;  %v529_v41 = vadd.f32 %v497_v39, %v423_v36  ;;  %v603_v42 = vsel %vm565_vm4, %v2041_v52, 0.0  ;;  %v760_v43 = vpack.c.bf16 %v742_v38, %v740_v35 }
  0x4a   : > { %v531_v44 = vadd.f32 %v499_v40, %v425_v37  ;;  %v605_v45 = vsel %vm567_vm5, %v2041_v52, 0.0  ;;  %vm671_vm6 = vcmp.eq.s32.totalorder %v2068_v62, %v1960_v6  ;;  %vm673_vm7 = vcmp.eq.s32.totalorder %v2068_v62, %v1963_v7 }
  0x4b   : > { %v635_v50 = vadd.f32 %v603_v42, %v529_v41  ;;  %v709_v53 = vsel %vm671_vm6, %v2079_v10, 0.0  ;;  %vm2880_vm10 = vcmp.eq.s32.totalorder %v1979_v18, %v1966_v8  ;;  %783 = vmatpush.bf16.msra.mxu0 %v760_v43  ;;  %1468 = vmatpush.bf16.msra.mxu2 %v760_v43  ;;  %v711_v55 = vsel %vm673_vm7, %v2079_v10, 0.0 }
  0x4c   : > { %v637_v54 = vadd.f32 %v605_v45, %v531_v44  ;;  %vm2882_vm11 = vcmp.eq.s32.totalorder %v1979_v18, %v1969_v9  ;;  %v418_v56 = vsel %vm2880_vm10, %v1981_v19, 0.0  ;;  %vm454_vm2 = vcmp.eq.s32.totalorder %v1983_v20, %v1966_v8 }
  0x4d   : > { %v741_v57 = vadd.f32 %v709_v53, %v635_v50  ;;  %v420_v58 = vsel %vm2882_vm11, %v1981_v19, 0.0  ;;  %vm456_vm3 = vcmp.eq.s32.totalorder %v1983_v20, %v1969_v9  ;;  %v492_v60 = vsel %vm454_vm2, %v1985_v21, 0.0 }
  0x4e   : > { %v743_v59 = vadd.f32 %v711_v55, %v637_v54  ;;  %v494_v61 = vsel %vm456_vm3, %v1985_v21, 0.0  ;;  %vm560_vm4 = vcmp.eq.s32.totalorder %v1987_v22, %v1966_v8  ;;  %v524_v63 = vadd.f32 %v492_v60, %v418_v56 }
  0x4f   : > { %v526_v0 = vadd.f32 %v494_v61, %v420_v58  ;;  %vm562_vm5 = vcmp.eq.s32.totalorder %v1987_v22, %v1969_v9  ;;  %v598_v4 = vsel %vm560_vm4, %v1989_v23, 0.0  ;;  %vm666_vm6 = vcmp.eq.s32.totalorder %v1991_v24, %v1966_v8 }
  0x50   : > { %v761_v5 = vpack.c.bf16 %v743_v59, %v741_v57  ;;  %v600_v11 = vsel %vm562_vm5, %v1989_v23, 0.0  ;;  %vm668_vm7 = vcmp.eq.s32.totalorder %v1991_v24, %v1969_v9  ;;  %v630_v12 = vadd.f32 %v598_v4, %v524_v63 }
  0x51   : > { %v632_v13 = vadd.f32 %v600_v11, %v526_v0  ;;  %v704_v14 = vsel %vm666_vm6, %v1993_v25, 0.0  ;;  %v706_v15 = vsel %vm668_vm7, %v1993_v25, 0.0  ;;  %vm2879_vm2 = vcmp.eq.s32.totalorder %v2031_v46, %v1966_v8 }
  0x52   : > { %807 = vmatpush.bf16.msra.mxu1 %v761_v5  ;;  %1476 = vmatpush.bf16.msra.mxu3 %v761_v5  ;;  %vm2881_vm3 = vcmp.eq.s32.totalorder %v2031_v46, %v1969_v9  ;;  %vm455_vm4 = vcmp.eq.s32.totalorder %v2035_v48, %v1966_v8  ;;  %v2176_v16 = vadd.s32 64, %v1945_v1  ;;  %v736_v17 = vadd.f32 %v704_v14, %v630_v12 }
  0x53   : > { %v738_v26 = vadd.f32 %v706_v15, %v632_v13  ;;  %v419_v27 = vsel %vm2879_vm2, %v2033_v47, 0.0  ;;  %v421_v28 = vsel %vm2881_vm3, %v2033_v47, 0.0  ;;  %vm457_vm5 = vcmp.eq.s32.totalorder %v2035_v48, %v1969_v9 }
  0x54   : > { %v493_v29 = vsel %vm455_vm4, %v2037_v49, 0.0  ;;  %vm561_vm6 = vcmp.eq.s32.totalorder %v2039_v51, %v1966_v8  ;;  %vm563_vm7 = vcmp.eq.s32.totalorder %v2039_v51, %v1969_v9  ;;  %v495_v31 = vsel %vm457_vm5, %v2037_v49, 0.0 }
  0x55   : > { %v758_v30 = vpack.c.bf16 %v738_v26, %v736_v17  ;;  %v525_v32 = vadd.f32 %v493_v29, %v419_v27  ;;  %v599_v33 = vsel %vm561_vm6, %v2041_v52, 0.0  ;;  %v527_v34 = vadd.f32 %v495_v31, %v421_v28 }
  0x56   : > { %v601_v35 = vsel %vm563_vm7, %v2041_v52, 0.0  ;;  %vm667_vm9 = vcmp.eq.s32.totalorder %v2068_v62, %v1966_v8  ;;  %vm669_vm4 = vcmp.eq.s32.totalorder %v2068_v62, %v1969_v9  ;;  %v2203_v39 = vadd.s32 72, %v1945_v1 }
  0x57   : > { %784 = vmatpush.bf16.msra.mxu0 %v758_v30  ;;  %1469 = vmatpush.bf16.msra.mxu2 %v758_v30  ;;  %v631_v36 = vadd.f32 %v599_v33, %v525_v32  ;;  %v705_v37 = vsel %vm667_vm9, %v2079_v10, 0.0  ;;  %v707_v38 = vsel %vm669_vm4, %v2079_v10, 0.0  ;;  %v633_v40 = vadd.f32 %v601_v35, %v527_v34 }
  0x58   : > { %vm375_vm5 = vcmp.eq.s32.totalorder %v1979_v18, %v2176_v16  ;;  %vm450_vm6 = vcmp.eq.s32.totalorder %v1983_v20, %v2176_v16  ;;  %vm556_vm7 = vcmp.eq.s32.totalorder %v1987_v22, %v2176_v16  ;;  %vm2884_vm1 = vcmp.eq.s32.totalorder %v1979_v18, %v2203_v39 }
  0x59   : > { %v737_v41 = vadd.f32 %v705_v37, %v631_v36  ;;  %v414_v42 = vsel %vm375_vm5, %v1981_v19, 0.0  ;;  %vm452_vm9 = vcmp.eq.s32.totalorder %v1983_v20, %v2203_v39  ;;  %v739_v43 = vadd.f32 %v707_v38, %v633_v40 }
  0x5a   : > { %v416_v44 = vsel %vm2884_vm1, %v1981_v19, 0.0  ;;  %v488_v45 = vsel %vm450_vm6, %v1985_v21, 0.0  ;;  %v490_v50 = vsel %vm452_vm9, %v1985_v21, 0.0  ;;  %vm558_vm4 = vcmp.eq.s32.totalorder %v1987_v22, %v2203_v39 }
  0x5b   : > { %v520_v53 = vadd.f32 %v488_v45, %v414_v42  ;;  %v522_v54 = vadd.f32 %v490_v50, %v416_v44  ;;  %v594_v55 = vsel %vm556_vm7, %v1989_v23, 0.0  ;;  %v759_v56 = vpack.c.bf16 %v739_v43, %v737_v41 }
  0x5c   : > { %v596_v57 = vsel %vm558_vm4, %v1989_v23, 0.0  ;;  %vm662_vm13 = vcmp.eq.s32.totalorder %v1991_v24, %v2176_v16  ;;  %vm664_vm15 = vcmp.eq.s32.totalorder %v1991_v24, %v2203_v39  ;;  %vm2891_vm6 = vcmp.eq.s32.totalorder %v2031_v46, %v2176_v16 }
  0x5d   : > { %v626_v58 = vadd.f32 %v594_v55, %v520_v53  ;;  %v628_v59 = vadd.f32 %v596_v57, %v522_v54  ;;  %v700_v60 = vsel %vm662_vm13, %v1993_v25, 0.0  ;;  %v702_v61 = vsel %vm664_vm15, %v1993_v25, 0.0  ;;  %808 = vmatpush.bf16.msra.mxu1 %v759_v56  ;;  %1477 = vmatpush.bf16.msra.mxu3 %v759_v56 }
  0x5e   : > { %vm2883_vm7 = vcmp.eq.s32.totalorder %v2031_v46, %v2203_v39  ;;  %vm451_vm9 = vcmp.eq.s32.totalorder %v2035_v48, %v2176_v16  ;;  %v2242_v63 = vadd.s32 48, %v1945_v1  ;;  %v415_v5 = vsel %vm2891_vm6, %v2033_v47, 0.0 }
  0x5f   : > { %v732_v0 = vadd.f32 %v700_v60, %v626_v58  ;;  %v734_v4 = vadd.f32 %v702_v61, %v628_v59  ;;  %v417_v11 = vsel %vm2883_vm7, %v2033_v47, 0.0  ;;  %vm453_vm15 = vcmp.eq.s32.totalorder %v2035_v48, %v2203_v39 }
  0x60   : > { %v489_v12 = vsel %vm451_vm9, %v2037_v49, 0.0  ;;  %vm557_vm13 = vcmp.eq.s32.totalorder %v2039_v51, %v2176_v16  ;;  %vm559_vm4 = vcmp.eq.s32.totalorder %v2039_v51, %v2203_v39  ;;  %v491_v14 = vsel %vm453_vm15, %v2037_v49, 0.0 }
  0x61   : > { %v756_v13 = vpack.c.bf16 %v734_v4, %v732_v0  ;;  %v521_v15 = vadd.f32 %v489_v12, %v415_v5  ;;  %v595_v17 = vsel %vm557_vm13, %v2041_v52, 0.0  ;;  %v523_v26 = vadd.f32 %v491_v14, %v417_v11 }
  0x62   : > { %v597_v27 = vsel %vm559_vm4, %v2041_v52, 0.0  ;;  %vm663_vm8 = vcmp.eq.s32.totalorder %v2068_v62, %v2176_v16  ;;  %vm665_vm9 = vcmp.eq.s32.totalorder %v2068_v62, %v2203_v39  ;;  %v2269_v31 = vadd.s32 56, %v1945_v1 }
  0x63   : > { %785 = vmatpush.bf16.msra.mxu0 %v756_v13  ;;  %1470 = vmatpush.bf16.msra.mxu2 %v756_v13  ;;  %v627_v28 = vadd.f32 %v595_v17, %v521_v15  ;;  %v701_v29 = vsel %vm663_vm8, %v2079_v10, 0.0  ;;  %v703_v30 = vsel %vm665_vm9, %v2079_v10, 0.0  ;;  %v629_v32 = vadd.f32 %v597_v27, %v523_v26 }
  0x64   : > { %vm2888_vm15 = vcmp.eq.s32.totalorder %v1979_v18, %v2242_v63  ;;  %vm446_vm13 = vcmp.eq.s32.totalorder %v1983_v20, %v2242_v63  ;;  %vm552_vm4 = vcmp.eq.s32.totalorder %v1987_v22, %v2242_v63  ;;  %vm2886_vm0 = vcmp.eq.s32.totalorder %v1979_v18, %v2269_v31 }
  0x65   : > { %v733_v33 = vadd.f32 %v701_v29, %v627_v28  ;;  %v410_v34 = vsel %vm2888_vm15, %v1981_v19, 0.0  ;;  %vm448_vm8 = vcmp.eq.s32.totalorder %v1983_v20, %v2269_v31  ;;  %v735_v35 = vadd.f32 %v703_v30, %v629_v32 }
  0x66   : > { %v412_v36 = vsel %vm2886_vm0, %v1981_v19, 0.0  ;;  %v484_v37 = vsel %vm446_vm13, %v1985_v21, 0.0  ;;  %v486_v38 = vsel %vm448_vm8, %v1985_v21, 0.0  ;;  %vm554_vm9 = vcmp.eq.s32.totalorder %v1987_v22, %v2269_v31 }
  0x67   : > { %v516_v40 = vadd.f32 %v484_v37, %v410_v34  ;;  %v518_v41 = vadd.f32 %v486_v38, %v412_v36  ;;  %v590_v42 = vsel %vm552_vm4, %v1989_v23, 0.0  ;;  %v757_v43 = vpack.c.bf16 %v735_v35, %v733_v33 }
  0x68   : > { %v592_v44 = vsel %vm554_vm9, %v1989_v23, 0.0  ;;  %vm658_vm12 = vcmp.eq.s32.totalorder %v1991_v24, %v2242_v63  ;;  %vm660_vm14 = vcmp.eq.s32.totalorder %v1991_v24, %v2269_v31  ;;  %vm2887_vm13 = vcmp.eq.s32.totalorder %v2031_v46, %v2242_v63 }
  0x69   : > { %v622_v45 = vadd.f32 %v590_v42, %v516_v40  ;;  %v624_v50 = vadd.f32 %v592_v44, %v518_v41  ;;  %v696_v53 = vsel %vm658_vm12, %v1993_v25, 0.0  ;;  %v698_v54 = vsel %vm660_vm14, %v1993_v25, 0.0  ;;  %809 = vmatpush.bf16.msra.mxu1 %v757_v43  ;;  %1478 = vmatpush.bf16.msra.mxu3 %v757_v43 }
  0x6a   : > { %vm2885_vm4 = vcmp.eq.s32.totalorder %v2031_v46, %v2269_v31  ;;  %vm447_vm8 = vcmp.eq.s32.totalorder %v2035_v48, %v2242_v63  ;;  %v2308_v55 = vadd.s32 32, %v1945_v1  ;;  %v411_v58 = vsel %vm2887_vm13, %v2033_v47, 0.0 }
  0x6b   : > { %v728_v56 = vadd.f32 %v696_v53, %v622_v45  ;;  %v730_v57 = vadd.f32 %v698_v54, %v624_v50  ;;  %v413_v59 = vsel %vm2885_vm4, %v2033_v47, 0.0  ;;  %vm449_vm14 = vcmp.eq.s32.totalorder %v2035_v48, %v2269_v31 }
  0x6c   : > { %v485_v60 = vsel %vm447_vm8, %v2037_v49, 0.0  ;;  %vm553_vm12 = vcmp.eq.s32.totalorder %v2039_v51, %v2242_v63  ;;  %vm555_vm9 = vcmp.eq.s32.totalorder %v2039_v51, %v2269_v31  ;;  %v487_v0 = vsel %vm449_vm14, %v2037_v49, 0.0 }
  0x6d   : > { %v754_v61 = vpack.c.bf16 %v730_v57, %v728_v56  ;;  %v517_v4 = vadd.f32 %v485_v60, %v411_v58  ;;  %v591_v5 = vsel %vm553_vm12, %v2041_v52, 0.0  ;;  %v519_v11 = vadd.f32 %v487_v0, %v413_v59 }
  0x6e   : > { %v593_v12 = vsel %vm555_vm9, %v2041_v52, 0.0  ;;  %vm659_vm2 = vcmp.eq.s32.totalorder %v2068_v62, %v2242_v63  ;;  %vm661_vm8 = vcmp.eq.s32.totalorder %v2068_v62, %v2269_v31  ;;  %v2335_v17 = vadd.s32 40, %v1945_v1 }
  0x6f   : > { %786 = vmatpush.bf16.msra.mxu0 %v754_v61  ;;  %1471 = vmatpush.bf16.msra.mxu2 %v754_v61  ;;  %v623_v13 = vadd.f32 %v591_v5, %v517_v4  ;;  %v697_v14 = vsel %vm659_vm2, %v2079_v10, 0.0  ;;  %v699_v15 = vsel %vm661_vm8, %v2079_v10, 0.0  ;;  %v625_v26 = vadd.f32 %v593_v12, %v519_v11 }
  0x70   : > { %vm367_vm14 = vcmp.eq.s32.totalorder %v1979_v18, %v2308_v55  ;;  %vm442_vm12 = vcmp.eq.s32.totalorder %v1983_v20, %v2308_v55  ;;  %vm548_vm9 = vcmp.eq.s32.totalorder %v1987_v22, %v2308_v55  ;;  %vm369_vm10 = vcmp.eq.s32.totalorder %v1979_v18, %v2335_v17 }
  0x71   : > { %v729_v27 = vadd.f32 %v697_v14, %v623_v13  ;;  %v406_v28 = vsel %vm367_vm14, %v1981_v19, 0.0  ;;  %vm444_vm2 = vcmp.eq.s32.totalorder %v1983_v20, %v2335_v17  ;;  %v731_v29 = vadd.f32 %v699_v15, %v625_v26 }
  0x72   : > { %v408_v30 = vsel %vm369_vm10, %v1981_v19, 0.0  ;;  %v480_v32 = vsel %vm442_vm12, %v1985_v21, 0.0  ;;  %v482_v33 = vsel %vm444_vm2, %v1985_v21, 0.0  ;;  %vm550_vm8 = vcmp.eq.s32.totalorder %v1987_v22, %v2335_v17 }
  0x73   : > { %v512_v34 = vadd.f32 %v480_v32, %v406_v28  ;;  %v514_v35 = vadd.f32 %v482_v33, %v408_v30  ;;  %v586_v36 = vsel %vm548_vm9, %v1989_v23, 0.0  ;;  %v755_v37 = vpack.c.bf16 %v731_v29, %v729_v27 }
  0x74   : > { %v588_v38 = vsel %vm550_vm8, %v1989_v23, 0.0  ;;  %vm654_vm3 = vcmp.eq.s32.totalorder %v1991_v24, %v2308_v55  ;;  %vm656_vm11 = vcmp.eq.s32.totalorder %v1991_v24, %v2335_v17  ;;  %vm368_vm12 = vcmp.eq.s32.totalorder %v2031_v46, %v2308_v55 }
  0x75   : > { %v618_v40 = vadd.f32 %v586_v36, %v512_v34  ;;  %v620_v41 = vadd.f32 %v588_v38, %v514_v35  ;;  %v692_v42 = vsel %vm654_vm3, %v1993_v25, 0.0  ;;  %v694_v43 = vsel %vm656_vm11, %v1993_v25, 0.0  ;;  %810 = vmatpush.bf16.msra.mxu1 %v755_v37  ;;  %1479 = vmatpush.bf16.msra.mxu3 %v755_v37 }
  0x76   : > { %vm370_vm9 = vcmp.eq.s32.totalorder %v2031_v46, %v2335_v17  ;;  %vm443_vm2 = vcmp.eq.s32.totalorder %v2035_v48, %v2308_v55  ;;  %v2374_v44 = vadd.s32 16, %v1945_v1  ;;  %v407_v53 = vsel %vm368_vm12, %v2033_v47, 0.0 }
  0x77   : > { %v724_v45 = vadd.f32 %v692_v42, %v618_v40  ;;  %v726_v50 = vadd.f32 %v694_v43, %v620_v41  ;;  %v409_v54 = vsel %vm370_vm9, %v2033_v47, 0.0  ;;  %vm445_vm11 = vcmp.eq.s32.totalorder %v2035_v48, %v2335_v17 }
  0x78   : > { %v481_v56 = vsel %vm443_vm2, %v2037_v49, 0.0  ;;  %vm549_vm3 = vcmp.eq.s32.totalorder %v2039_v51, %v2308_v55  ;;  %vm551_vm8 = vcmp.eq.s32.totalorder %v2039_v51, %v2335_v17  ;;  %v483_v58 = vsel %vm445_vm11, %v2037_v49, 0.0 }
  0x79   : > { %v752_v57 = vpack.c.bf16 %v726_v50, %v724_v45  ;;  %v513_v59 = vadd.f32 %v481_v56, %v407_v53  ;;  %v587_v60 = vsel %vm549_vm3, %v2041_v52, 0.0  ;;  %v515_v61 = vadd.f32 %v483_v58, %v409_v54 }
  0x7a   : > { %v589_v0 = vsel %vm551_vm8, %v2041_v52, 0.0  ;;  %vm655_vm7 = vcmp.eq.s32.totalorder %v2068_v62, %v2308_v55  ;;  %vm657_vm2 = vcmp.eq.s32.totalorder %v2068_v62, %v2335_v17  ;;  %v2401_v12 = vadd.s32 24, %v1945_v1 }
  0x7b   : > { %787 = vmatpush.bf16.msra.mxu0 %v752_v57  ;;  %1472 = vmatpush.bf16.msra.mxu2 %v752_v57  ;;  %v619_v4 = vadd.f32 %v587_v60, %v513_v59  ;;  %v693_v5 = vsel %vm655_vm7, %v2079_v10, 0.0  ;;  %v695_v11 = vsel %vm657_vm2, %v2079_v10, 0.0  ;;  %v621_v13 = vadd.f32 %v589_v0, %v515_v61 }
  0x7c   : > { %vm363_vm11 = vcmp.eq.s32.totalorder %v1979_v18, %v2374_v44  ;;  %vm438_vm3 = vcmp.eq.s32.totalorder %v1983_v20, %v2374_v44  ;;  %vm544_vm8 = vcmp.eq.s32.totalorder %v1987_v22, %v2374_v44  ;;  %vm2890_vm1 = vcmp.eq.s32.totalorder %v1979_v18, %v2401_v12 }
  0x7d   : > { %v725_v14 = vadd.f32 %v693_v5, %v619_v4  ;;  %v402_v15 = vsel %vm363_vm11, %v1981_v19, 0.0  ;;  %vm440_vm7 = vcmp.eq.s32.totalorder %v1983_v20, %v2401_v12  ;;  %v727_v26 = vadd.f32 %v695_v11, %v621_v13 }
  0x7e   : > { %v404_v27 = vsel %vm2890_vm1, %v1981_v19, 0.0  ;;  %v476_v28 = vsel %vm438_vm3, %v1985_v21, 0.0  ;;  %v478_v29 = vsel %vm440_vm7, %v1985_v21, 0.0  ;;  %vm546_vm2 = vcmp.eq.s32.totalorder %v1987_v22, %v2401_v12 }
  0x7f   : > { %v508_v30 = vadd.f32 %v476_v28, %v402_v15  ;;  %v510_v32 = vadd.f32 %v478_v29, %v404_v27  ;;  %v582_v33 = vsel %vm544_vm8, %v1989_v23, 0.0  ;;  %v753_v34 = vpack.c.bf16 %v727_v26, %v725_v14 }
  0x80   : > { %v584_v35 = vsel %vm546_vm2, %v1989_v23, 0.0  ;;  %vm650_vm4 = vcmp.eq.s32.totalorder %v1991_v24, %v2374_v44  ;;  %vm652_vm0 = vcmp.eq.s32.totalorder %v1991_v24, %v2401_v12  ;;  %vm364_vm3 = vcmp.eq.s32.totalorder %v2031_v46, %v2374_v44 }
  0x81   : > { %v614_v36 = vadd.f32 %v582_v33, %v508_v30  ;;  %v616_v37 = vadd.f32 %v584_v35, %v510_v32  ;;  %v688_v38 = vsel %vm650_vm4, %v1993_v25, 0.0  ;;  %v690_v40 = vsel %vm652_vm0, %v1993_v25, 0.0  ;;  %811 = vmatpush.bf16.msra.mxu1 %v753_v34  ;;  %1480 = vmatpush.bf16.msra.mxu3 %v753_v34 }
  0x82   : > { %vm2889_vm8 = vcmp.eq.s32.totalorder %v2031_v46, %v2401_v12  ;;  %vm439_vm7 = vcmp.eq.s32.totalorder %v2035_v48, %v2374_v44  ;;  %v2440_v41 = vadd.s32 8, %v1945_v1  ;;  %v403_v45 = vsel %vm364_vm3, %v2033_v47, 0.0 }
  0x83   : > { %v720_v42 = vadd.f32 %v688_v38, %v614_v36  ;;  %v722_v43 = vadd.f32 %v690_v40, %v616_v37  ;;  %v405_v50 = vsel %vm2889_vm8, %v2033_v47, 0.0  ;;  %vm441_vm0 = vcmp.eq.s32.totalorder %v2035_v48, %v2401_v12 }
  0x84   : > { %v477_v53 = vsel %vm439_vm7, %v2037_v49, 0.0  ;;  %vm545_vm4 = vcmp.eq.s32.totalorder %v2039_v51, %v2374_v44  ;;  %vm547_vm2 = vcmp.eq.s32.totalorder %v2039_v51, %v2401_v12  ;;  %v479_v56 = vsel %vm441_vm0, %v2037_v49, 0.0 }
  0x85   : > { %v750_v54 = vpack.c.bf16 %v722_v43, %v720_v42  ;;  %v509_v57 = vadd.f32 %v477_v53, %v403_v45  ;;  %v583_v58 = vsel %vm545_vm4, %v2041_v52, 0.0  ;;  %v511_v59 = vadd.f32 %v479_v56, %v405_v50 }
  0x86   : > { %v585_v60 = vsel %vm547_vm2, %v2041_v52, 0.0  ;;  %vm651_vm13 = vcmp.eq.s32.totalorder %v2068_v62, %v2374_v44  ;;  %vm653_vm7 = vcmp.eq.s32.totalorder %v2068_v62, %v2401_v12  ;;  %vm359_vm0 = vcmp.eq.s32.totalorder %v1979_v18, %v1945_v1 }
  0x87   : > { %788 = vmatpush.bf16.msra.mxu0 %v750_v54  ;;  %1473 = vmatpush.bf16.msra.mxu2 %v750_v54  ;;  %v615_v61 = vadd.f32 %v583_v58, %v509_v57  ;;  %v689_v0 = vsel %vm651_vm13, %v2079_v10, 0.0  ;;  %v691_v4 = vsel %vm653_vm7, %v2079_v10, 0.0  ;;  %v617_v5 = vadd.f32 %v585_v60, %v511_v59 }
  0x88   : > { %vm361_vm4 = vcmp.eq.s32.totalorder %v1979_v18, %v2440_v41  ;;  %v398_v11 = vsel %vm359_vm0, %v1981_v19, 0.0  ;;  %vm434_vm2 = vcmp.eq.s32.totalorder %v1983_v20, %v1945_v1  ;;  %vm436_vm13 = vcmp.eq.s32.totalorder %v1983_v20, %v2440_v41 }
  0x89   : > { %v721_v13 = vadd.f32 %v689_v0, %v615_v61  ;;  %v400_v14 = vsel %vm361_vm4, %v1981_v19, 0.0  ;;  %v472_v15 = vsel %vm434_vm2, %v1985_v21, 0.0  ;;  %v723_v26 = vadd.f32 %v691_v4, %v617_v5 }
  0x8a   : > { %v474_v27 = vsel %vm436_vm13, %v1985_v21, 0.0  ;;  %v504_v28 = vadd.f32 %v472_v15, %v398_v11  ;;  %vm540_vm7 = vcmp.eq.s32.totalorder %v1987_v22, %v1945_v1  ;;  %vm542_vm15 = vcmp.eq.s32.totalorder %v1987_v22, %v2440_v41 }
  0x8b   : > { %v506_v29 = vadd.f32 %v474_v27, %v400_v14  ;;  %v578_v30 = vsel %vm540_vm7, %v1989_v23, 0.0  ;;  %vm646_vm8 = vcmp.eq.s32.totalorder %v1991_v24, %v1945_v1  ;;  %v751_v19 = vpack.c.bf16 %v723_v26, %v721_v13 }
  0x8c   : > { %v580_v20 = vsel %vm542_vm15, %v1989_v23, 0.0  ;;  %v610_v32 = vadd.f32 %v578_v30, %v504_v28  ;;  %vm648_vm2 = vcmp.eq.s32.totalorder %v1991_v24, %v2440_v41  ;;  %v684_v33 = vsel %vm646_vm8, %v1993_v25, 0.0  ;;  %v1456_v30 = vld [vmem:[#allocation6 + $0x10] sm:$0xf] }
  0x8d   : > { %v612_v21 = vadd.f32 %v580_v20, %v506_v29  ;;  %v686_v34 = vsel %vm648_vm2, %v1993_v25, 0.0  ;;  %vm360_vm13 = vcmp.eq.s32.totalorder %v2031_v46, %v1945_v1  ;;  %812 = vmatpush.bf16.msra.mxu1 %v751_v19  ;;  %1481 = vmatpush.bf16.msra.mxu3 %v751_v19  ;;  %vm362_vm7 = vcmp.eq.s32.totalorder %v2031_v46, %v2440_v41  ;;  %v1466_v19 = vld [vmem:[#allocation6 + $0x10] sm:$0x10] }
  0x8e   : > { %v716_v22 = vadd.f32 %v684_v33, %v610_v32  ;;  %v399_v23 = vsel %vm360_vm13, %v2033_v47, 0.0  ;;  %vm435_vm15 = vcmp.eq.s32.totalorder %v2035_v48, %v1945_v1  ;;  %v401_v25 = vsel %vm362_vm7, %v2033_v47, 0.0 }
  0x8f   : > { %v718_v24 = vadd.f32 %v686_v34, %v612_v21  ;;  %vm437_vm8 = vcmp.eq.s32.totalorder %v2035_v48, %v2440_v41  ;;  %v473_v35 = vsel %vm435_vm15, %v2037_v49, 0.0  ;;  %vm541_vm2 = vcmp.eq.s32.totalorder %v2039_v51, %v1945_v1  ;;  %v1464_v48 = vld [vmem:[#allocation6] sm:$0xff] }
  0x90   : > { %v475_v36 = vsel %vm437_vm8, %v2037_v49, 0.0  ;;  %v505_v37 = vadd.f32 %v473_v35, %v399_v23  ;;  %vm543_vm1 = vcmp.eq.s32.totalorder %v2039_v51, %v2440_v41  ;;  %v579_v42 = vsel %vm541_vm2, %v2041_v52, 0.0  ;;  %v1465_v49 = vld [vmem:[#allocation6 + $0x8] sm:$0xff] }
  0x91   : > { %v748_v38 = vpack.c.bf16 %v718_v24, %v716_v22  ;;  %v507_v40 = vadd.f32 %v475_v36, %v401_v25  ;;  %v581_v47 = vsel %vm543_vm1, %v2041_v52, 0.0  ;;  %vm647_vm6 = vcmp.eq.s32.totalorder %v2068_v62, %v1945_v1 }
  0x92   : > { %v611_v43 = vadd.f32 %v579_v42, %v505_v37  ;;  %vm649_vm15 = vcmp.eq.s32.totalorder %v2068_v62, %v2440_v41  ;;  %v685_v51 = vsel %vm647_vm6, %v2079_v10, 0.0  ;;  %v1809_v54 = vmov 0.0  }
  0x93   : > { %789 = vmatpush.bf16.msra.mxu0 %v748_v38  ;;  %1474 = vmatpush.bf16.msra.mxu2 %v748_v38  ;;  %v613_v45 = vadd.f32 %v581_v47, %v507_v40  ;;  %v687_v50 = vsel %vm649_vm15, %v2079_v10, 0.0  ;;  %v1132_v52 = vsel %vm359_vm0, 1.0, %v1809_v54  ;;  %v1133_v62 = vsel %vm360_vm13, 1.0, %v1809_v54 }
  0x94   : > { %v717_v53 = vadd.f32 %v685_v51, %v611_v43  ;;  %v1140_v56 = vsel %vm367_vm14, 1.0, %v1809_v54  ;;  %v1164_v58 = vmax.f32 %v1132_v52, %v1133_v62  ;;  %v1141_v10 = vsel %vm368_vm12, 1.0, %v1809_v54 }
  0x95   : > { %v719_v57 = vadd.f32 %v687_v50, %v613_v45  ;;  %v1136_v59 = vsel %vm363_vm11, 1.0, %v1809_v54  ;;  %v1176_v60 = vmax.f32 %v1140_v56, %v1141_v10  ;;  %v1137_v61 = vsel %vm364_vm3, 1.0, %v1809_v54 }
  0x96   : > { %790 = vmatmul.bf16.vlgmr.msra.gmra.mxu0 %v1464_v48  ;;  %795 = vmatmul.bf16.vlgmr.msra.gmra.mxu2 %v1465_v49  ;;  %v1170_v4 = vmax.f32 %v1136_v59, %v1137_v61  ;;  %v1134_v55 = vsel %vm361_vm4, 1.0, %v1809_v54  ;;  %v1135_v5 = vsel %vm362_vm7, 1.0, %v1809_v54  ;;  %v1142_v44 = vsel %vm369_vm10, 1.0, %v1809_v54 }
  0x97   : > { %v749_v0 = vpack.c.bf16 %v719_v57, %v717_v53  ;;  %1165 = vmax.xlane.f32.xlu0 %v1164_v58  ;;  %1177 = vmax.xlane.f32.xlu2 %v1176_v60  ;;  %v1143_v11 = vsel %vm370_vm9, 1.0, %v1809_v54  ;;  %v1148_v13 = vsel %vm375_vm5, 1.0, %v1809_v54  ;;  %vm2900_vm1 = vcmp.eq.s32.totalorder %v2031_v46, %v2176_v16 }
  0x98   : > { %1171 = vmax.xlane.f32.xlu1 %v1170_v4  ;;  %v1149_v14 = vsel %vm2900_vm1, 1.0, %v1809_v54  ;;  %v1167_v15 = vmax.f32 %v1134_v55, %v1135_v5  ;;  %vm2901_vm10 = vcmp.eq.s32.totalorder %v1979_v18, %v2401_v12  ;;  %vm2902_vm6 = vcmp.eq.s32.totalorder %v2031_v46, %v2401_v12 }
  0x99   : > { %813 = vmatpush.bf16.msra.mxu1 %v749_v0  ;;  %1482 = vmatpush.bf16.msra.mxu3 %v749_v0  ;;  %v1138_v26 = vsel %vm2901_vm10, 1.0, %v1809_v54  ;;  %v1139_v17 = vsel %vm2902_vm6, 1.0, %v1809_v54  ;;  %v1188_v27 = vmax.f32 %v1148_v13, %v1149_v14  ;;  %v1179_v28 = vmax.f32 %v1142_v44, %v1143_v11 }
  0x9a   : > { %v1173_v29 = vmax.f32 %v1138_v26, %v1139_v17  ;;  %vm2903_vm5 = vcmp.eq.s32.totalorder %v1979_v18, %v2242_v63  ;;  %vm2904_vm14 = vcmp.eq.s32.totalorder %v2031_v46, %v2242_v63  ;;  %v1457_v20 = vor.u32 %v1466_v19, %v1456_v30 }
  0x9b   : > { %v1144_v16 = vsel %vm2903_vm5, 1.0, %v1809_v54  ;;  %v1145_v12 = vsel %vm2904_vm14, 1.0, %v1809_v54  ;;  %vm2905_vm12 = vcmp.eq.s32.totalorder %v1979_v18, %v2269_v31  ;;  %vm2906_vm9 = vcmp.eq.s32.totalorder %v2031_v46, %v2269_v31 }
  0x9c   : > { %814 = vmatmul.bf16.vlgmr.msra.gmra.mxu1 %v1464_v48  ;;  %819 = vmatmul.bf16.vlgmr.msra.gmra.mxu3 %v1465_v49  ;;  %v1182_v32 = vmax.f32 %v1144_v16, %v1145_v12  ;;  %v1146_v21 = vsel %vm2905_vm12, 1.0, %v1809_v54  ;;  %v1147_v33 = vsel %vm2906_vm9, 1.0, %v1809_v54  ;;  %vm2907_vm11 = vcmp.eq.s32.totalorder %v1979_v18, %v2203_v39 }
  0x9d   : > { %v1185_v34 = vmax.f32 %v1146_v21, %v1147_v33  ;;  %v1150_v63 = vsel %vm2907_vm11, 1.0, %v1809_v54  ;;  %vm2908_vm3 = vcmp.eq.s32.totalorder %v2031_v46, %v2203_v39  ;;  %vm2909_vm0 = vcmp.eq.s32.totalorder %v1979_v18, %v1969_v9 }
  0x9e   : > { %v1151_v22 = vsel %vm2908_vm3, 1.0, %v1809_v54  ;;  %v1154_v31 = vsel %vm2909_vm0, 1.0, %v1809_v54  ;;  %vm2910_vm4 = vcmp.eq.s32.totalorder %v2031_v46, %v1969_v9  ;;  %vm2911_vm13 = vcmp.eq.s32.totalorder %v1979_v18, %v1966_v8 }
  0x9f   : > { %1168 = vmax.xlane.f32.xlu0 %v1167_v15  ;;  %1180 = vmax.xlane.f32.xlu2 %v1179_v28  ;;  %v1155_v23 = vsel %vm2910_vm4, 1.0, %v1809_v54  ;;  %v1191_v24 = vmax.f32 %v1150_v63, %v1151_v22  ;;  %v1152_v25 = vsel %vm2911_vm13, 1.0, %v1809_v54  ;;  %vm2912_vm7 = vcmp.eq.s32.totalorder %v2031_v46, %v1966_v8 }
  0xa0   : > { %1174 = vmax.xlane.f32.xlu1 %v1173_v29  ;;  %v1153_v39 = vsel %vm2912_vm7, 1.0, %v1809_v54  ;;  %v1197_v35 = vmax.f32 %v1154_v31, %v1155_v23  ;;  %vm2913_vm8 = vcmp.eq.s32.totalorder %v1979_v18, %v1960_v6  ;;  %vm2914_vm2 = vcmp.eq.s32.totalorder %v2031_v46, %v1960_v6 }
  0xa1   : > { %v1194_v36 = vmax.f32 %v1152_v25, %v1153_v39  ;;  %v1156_v9 = vsel %vm2913_vm8, 1.0, %v1809_v54  ;;  %v1157_v37 = vsel %vm2914_vm2, 1.0, %v1809_v54  ;;  %vm2915_vm15 = vcmp.eq.s32.totalorder %v1979_v18, %v1948_v2 }
  0xa2   : > { %v1160_v8 = vsel %vm2915_vm15, 1.0, %v1809_v54  ;;  %vm2916_vm1 = vcmp.eq.s32.totalorder %v2031_v46, %v1948_v2  ;;  %v1200_v40 = vmax.f32 %v1156_v9, %v1157_v37  ;;  %vm2917_vm10 = vcmp.eq.s32.totalorder %v1979_v18, %v1963_v7 }
  0xa3   : > { %v1161_v38 = vsel %vm2916_vm1, 1.0, %v1809_v54  ;;  %v1158_v6 = vsel %vm2917_vm10, 1.0, %v1809_v54  ;;  %vm2918_vm6 = vcmp.eq.s32.totalorder %v2031_v46, %v1963_v7  ;;  %vm2919_vm5 = vcmp.eq.s32.totalorder %v1979_v18, %v1951_v3 }
  0xa4   : > { %v1159_v42 = vsel %vm2918_vm6, 1.0, %v1809_v54  ;;  %v1206_v47 = vmax.f32 %v1160_v8, %v1161_v38  ;;  %v1162_v2 = vsel %vm2919_vm5, 1.0, %v1809_v54  ;;  %vm2920_vm14 = vcmp.eq.s32.totalorder %v2031_v46, %v1951_v3 }
  0xa5   : > { %v1203_v43 = vmax.f32 %v1158_v6, %v1159_v42  ;;  %v1163_v48 = vsel %vm2920_vm14, 1.0, %v1809_v54  ;;  %vm830_vm12 = vcmp.ge.s32.totalorder %v1945_v1, 6  ;;  %vm837_vm9 = vcmp.lt.s32.totalorder %v2440_v41, 9 }
  0xa6   : > { %800 = vmatmul.bf16.gmra.mxu2 %v1457_v20  ;;  %v1209_v49 = vmax.f32 %v1162_v2, %v1163_v48  ;;  %vm869_vm3 = vcmask 1040384   ;;  %vm1228_vm0 = vcmask 7168   ;;  %v1810_v10 = vmov -inf  }
  0xa7   : > { %1183 = vmax.xlane.f32.xlu0 %v1182_v32  ;;  %1189 = vmax.xlane.f32.xlu2 %v1188_v27  ;;  %v870_v59 = vsel %vm869_vm3, -1e+30, %v1810_v10  ;;  %vm849_vm7 = vcmp.ge.s32.totalorder %v2440_v41, 9 }
  0xa8   : > { %1186 = vmax.xlane.f32.xlu1 %v1185_v34 }
  0xac   : > { %824 = vmatmul.bf16.gmra.mxu3 %v1457_v20 }
  0xaf   : > { %1192 = vmax.xlane.f32.xlu0 %v1191_v24  ;;  %1198 = vmax.xlane.f32.xlu2 %v1197_v35 }
  0xb0   : > { %1195 = vmax.xlane.f32.xlu1 %v1194_v36 }
  0xb7   : > { %1201 = vmax.xlane.f32.xlu0 %v1200_v40  ;;  %1207 = vmax.xlane.f32.xlu2 %v1206_v47 }
  0xb8   : > { %1204 = vmax.xlane.f32.xlu1 %v1203_v43 }
  0xbf   : > { %1210 = vmax.xlane.f32.xlu0 %v1209_v49 }
 0x10a   : > { %v1166_v45 = vpop.xlane.xlu0 %1165  ;;  %v1178_v5 = vpop.xlane.xlu2 %1177 }
 0x10b   : > { %v1485_v51 = vceil.f32 %v1166_v45  ;;  %v1486_v3 = vfloor.f32 %v1166_v45  ;;  %vm1484_vm11 = vcmp.lt.s32.totalorder %v1166_v45, 0  ;;  %v1505_v44 = vceil.f32 %v1178_v5  ;;  %v1172_v13 = vpop.xlane.xlu1 %1171 }
 0x10c   : > { %v1506_v11 = vfloor.f32 %v1178_v5  ;;  %vm1504_vm4 = vcmp.lt.s32.totalorder %v1178_v5, 0  ;;  %v1495_v27 = vceil.f32 %v1172_v13  ;;  %vm1494_vm13 = vcmp.lt.s32.totalorder %v1172_v13, 0 }
 0x10d   : > { %v1487_v52 = vsel %vm1484_vm11, %v1485_v51, %v1486_v3  ;;  %v1496_v20 = vfloor.f32 %v1172_v13 }
 0x10e   : > { %v1488_v62 = vcvt.f32.s32 %v1487_v52  ;;  %v1507_v30 = vsel %vm1504_vm4, %v1505_v44, %v1506_v11 }
 0x10f   : > { %v1508_v12 = vcvt.f32.s32 %v1507_v30  ;;  %v1497_v63 = vsel %vm1494_vm13, %v1495_v27, %v1496_v20 }
 0x110   : > { %1229 = vst.msk [vmem:[%s2673_s13] sm:$0xff] %vm1228_vm0, %v1488_v62  ;;  %v1498_v22 = vcvt.f32.s32 %v1497_v63 }
 0x111   : > { %1233 = vst.msk [vmem:[%s2673_s13 + $0x20] sm:$0xff] %vm1228_vm0, %v1508_v12 }
 0x112   : > { %v1169_v14 = vpop.xlane.xlu0 %1168  ;;  %v1181_v39 = vpop.xlane.xlu2 %1180  ;;  %1231 = vst.msk [vmem:[%s2673_s13 + $0x10] sm:$0xff] %vm1228_vm0, %v1498_v22 }
 0x113   : > { %v2658_v7 = vpop.f32.mrf.mxu0  ;;  %v1490_v21 = vceil.f32 %v1169_v14  ;;  %vm1489_vm8 = vcmp.lt.s32.totalorder %v1169_v14, 0  ;;  %v1491_v31 = vfloor.f32 %v1169_v14  ;;  %v1510_v9 = vceil.f32 %v1181_v39  ;;  %v1175_v8 = vpop.xlane.xlu1 %1174 }
 0x114   : > { %v854_v18 = vsel %vm830_vm12, %v2658_v7, -1e+30  ;;  %v1511_v37 = vfloor.f32 %v1181_v39  ;;  %vm1509_vm2 = vcmp.lt.s32.totalorder %v1181_v39, 0  ;;  %vm1499_vm15 = vcmp.lt.s32.totalorder %v1175_v8, 0 }
 0x115   : > { %v866_v46 = vmax.f32 %v854_v18, -1e+30  ;;  %v1492_v36 = vsel %vm1489_vm8, %v1490_v21, %v1491_v31  ;;  %v1500_v51 = vceil.f32 %v1175_v8  ;;  %v1501_v52 = vfloor.f32 %v1175_v8 }
 0x116   : > { %v1493_v47 = vcvt.f32.s32 %v1492_v36  ;;  %v1512_v48 = vsel %vm1509_vm2, %v1510_v9, %v1511_v37 }
 0x117   : > { %v868_v60 = vmax.f32 %v866_v46, -1e+30  ;;  %v1513_v45 = vcvt.f32.s32 %v1512_v48 }
 0x118   : > { %1230 = vst.msk [vmem:[%s2673_s13 + $0x8] sm:$0xff] %vm1228_vm0, %v1493_v47 }
 0x119   : > { %v2666_v50 = vpop.f32.mrf.mxu1  ;;  %v2668_v53 = vpop.f32.mrf.mxu2  ;;  %1234 = vst.msk [vmem:[%s2673_s13 + $0x28] sm:$0xff] %vm1228_vm0, %v1513_v45 }
 0x11a   : > { %v855_v56 = vsel %vm830_vm12, %v2666_v50, -1e+30  ;;  %v1184_v38 = vpop.xlane.xlu0 %1183  ;;  %v981_v43 = vmul.f32 %v2668_v53, %v2668_v53  ;;  %v1190_v14 = vpop.xlane.xlu2 %1189 }
 0x11b   : > { %v2678_v57 = vpop.f32.mrf.mxu0  ;;  %v879_v0 = vmax.f32 %v855_v56, -1e+30  ;;  %v1515_v62 = vceil.f32 %v1184_v38  ;;  %vm1514_vm1 = vcmp.lt.s32.totalorder %v1184_v38, 0  ;;  %v1516_v10 = vfloor.f32 %v1184_v38  ;;  %v1187_v30 = vpop.xlane.xlu1 %1186 }
 0x11c   : > { %v856_v58 = vsel %vm837_vm9, %v2678_v57, -1e+30  ;;  %v979_v32 = vmul.f32 %v2678_v57, %v2678_v57  ;;  %vm1524_vm10 = vcmp.lt.s32.totalorder %v1190_v14, 0  ;;  %vm1519_vm6 = vcmp.lt.s32.totalorder %v1187_v30, 0 }
 0x11d   : > { %v867_v61 = vmax.f32 %v856_v58, -1e+30  ;;  %v881_v28 = vmax.f32 %v879_v0, -1e+30  ;;  %v1502_v0 = vsel %vm1499_vm15, %v1500_v51, %v1501_v52  ;;  %v1517_v27 = vsel %vm1514_vm1, %v1515_v62, %v1516_v10 }
 0x11e   : > { %v991_v35 = vsel %vm849_vm7, %v979_v32, 0.0  ;;  %v1503_v13 = vcvt.f32.s32 %v1502_v0  ;;  %v1518_v31 = vcvt.f32.s32 %v1517_v27  ;;  %v1520_v38 = vceil.f32 %v1187_v30 }
 0x11f   : > { %v2686_v4 = vpop.f32.mrf.mxu3  ;;  %v871_v55 = vmax.f32 %v867_v61, %v870_v59  ;;  %v1002_v46 = vadd.f32 %v991_v35, %v981_v43 }
 0x120   : > { %1232 = vst.msk [vmem:[%s2673_s13 + $0x18] sm:$0xff] %vm1228_vm0, %v1503_v13 }
 0x121   : > { %v872_v15 = vmax.f32 %v868_v60, %v871_v55  ;;  %v2688_v26 = vpop.f32.mrf.mxu1  ;;  %v2690_v17 = vpop.f32.mrf.mxu2  ;;  %1235 = vst.msk [vmem:[%s2673_s13 + $0x30] sm:$0xff] %vm1228_vm0, %v1518_v31 }
 0x122   : > { %v857_v29 = vsel %vm837_vm9, %v2688_v26, -1e+30  ;;  %v980_v2 = vmul.f32 %v2688_v26, %v2688_v26  ;;  %v983_v3 = vmul.f32 %v2690_v17, %v2690_v17  ;;  %v1193_v32 = vpop.xlane.xlu0 %1192  ;;  %v1199_v48 = vpop.xlane.xlu2 %1198 }
 0x123   : > { %v873_v19 = vrot.slane %v872_v15, 4  ;;  %v880_v16 = vmax.f32 %v857_v29, -1e+30  ;;  %v1526_v29 = vfloor.f32 %v1190_v14  ;;  %vm1529_vm5 = vcmp.lt.s32.totalorder %v1193_v32, 0 }
 0x124   : > { %v992_v60 = vsel %vm849_vm7, %v980_v2, 0.0  ;;  %v1530_v2 = vceil.f32 %v1193_v32  ;;  %v1531_v62 = vfloor.f32 %v1193_v32  ;;  %vm1539_vm14 = vcmp.lt.s32.totalorder %v1199_v48, 0 }
 0x125   : > { %v874_v33 = vmax.f32 %v872_v15, %v873_v19  ;;  %v883_v34 = vmax.f32 %v880_v16, %v870_v59  ;;  %v982_v59 = vmul.f32 %v2686_v4, %v2686_v4  ;;  %v1003_v15 = vadd.f32 %v1002_v46, %v983_v3 }
 0x126   : > { %v1540_v13 = vceil.f32 %v1199_v48 }
 0x127   : > { %v875_v23 = vrot.slane %v874_v33, 2  ;;  %v884_v24 = vmax.f32 %v881_v28, %v883_v34  ;;  %v2700_v25 = vpop.f32.mrf.mxu3  ;;  %v1525_v28 = vceil.f32 %v1190_v14  ;;  %v1541_v14 = vfloor.f32 %v1199_v48 }
 0x128   : > { %v984_v12 = vmul.f32 %v2700_v25, %v2700_v25 }
 0x129   : > { %v876_v40 = vmax.f32 %v874_v33, %v875_v23  ;;  %v885_v6 = vrot.slane %v884_v24, 4  ;;  %v2706_v42 = vpop.f32.mrf.mxu2  ;;  %v1014_v33 = vadd.f32 %v992_v60, %v982_v59  ;;  %v1527_v39 = vsel %vm1524_vm10, %v1525_v28, %v1526_v29 }
 0x12a   : > { %v985_v61 = vmul.f32 %v2706_v42, %v2706_v42  ;;  %v1528_v9 = vcvt.f32.s32 %v1527_v39 }
 0x12b   : > { %v877_v49 = vrot.slane %v876_v40, 1  ;;  %v886_v18 = vmax.f32 %v884_v24, %v885_v6  ;;  %v1015_v35 = vadd.f32 %v1014_v33, %v984_v12 }
 0x12c   : > { %v1004_v34 = vadd.f32 %v1003_v15, %v985_v61  ;;  %1237 = vst.msk [vmem:[%s2673_s13 + $0x40] sm:$0xff] %vm1228_vm0, %v1528_v9 }
 0x12d   : > { %v878_v56 = vmax.f32 %v876_v40, %v877_v49  ;;  %v887_v58 = vrot.slane %v886_v18, 2  ;;  %v1521_v40 = vfloor.f32 %v1187_v30  ;;  %v1542_v30 = vsel %vm1539_vm14, %v1540_v13, %v1541_v14 }
 0x12f   : > { %v891_v55 = vsub.f32 %v2658_v7, %v878_v56  ;;  %v893_v5 = vsub.f32 %v2678_v57, %v878_v56  ;;  %v888_v44 = vmax.f32 %v886_v18, %v887_v58  ;;  %v2727_v11 = vpop.f32.mrf.mxu3  ;;  %v1522_v51 = vsel %vm1519_vm6, %v1520_v38, %v1521_v40  ;;  %v1196_v56 = vpop.xlane.xlu1 %1195 }
 0x130   : > { %v986_v22 = vmul.f32 %v2727_v11, %v2727_v11  ;;  %v1523_v52 = vcvt.f32.s32 %v1522_v51  ;;  %vm1534_vm11 = vcmp.lt.s32.totalorder %v1196_v56, 0 }
 0x131   : > { %v903_v19 = vmul.f32 1.442695, %v891_v55  ;;  %v907_v16 = vmul.f32 1.442695, %v893_v5  ;;  %v2731_v20 = vpop.f32.mrf.mxu2  ;;  %v889_v21 = vrot.slane %v888_v44, 1  ;;  %v1202_v55 = vpop.xlane.xlu0 %1201 }
 0x132   : > { %v987_v63 = vmul.f32 %v2731_v20, %v2731_v20  ;;  %v1016_v6 = vadd.f32 %v1015_v35, %v986_v22  ;;  %1236 = vst.msk [vmem:[%s2673_s13 + $0x38] sm:$0xff] %vm1228_vm0, %v1523_v52  ;;  %v1545_v22 = vceil.f32 %v1202_v55  ;;  %v1546_v31 = vfloor.f32 %v1202_v55 }
 0x133   : > { %1639 = vpow2.f32 %v903_v19  ;;  %v890_v23 = vmax.f32 %v888_v44, %v889_v21  ;;  %v1532_v44 = vsel %vm1529_vm5, %v1530_v2, %v1531_v62  ;;  %v1535_v19 = vceil.f32 %v1196_v56 }
 0x134   : > { %1641 = vpow2.f32 %v907_v16  ;;  %v1005_v24 = vsel %vm869_vm3, %v987_v63, 0.0  ;;  %v1533_v28 = vcvt.f32.s32 %v1532_v44  ;;  %v1536_v16 = vfloor.f32 %v1196_v56 }
 0x135   : > { %v1006_v36 = vadd.f32 %v1005_v24, %v1004_v34  ;;  %v892_v37 = vsub.f32 %v2666_v50, %v890_v23  ;;  %v894_v8 = vsub.f32 %v2688_v26, %v890_v23  ;;  %v1543_v21 = vcvt.f32.s32 %v1542_v30 }
 0x136   : > { %1238 = vst.msk [vmem:[%s2673_s13 + $0x48] sm:$0xff] %vm1228_vm0, %v1533_v28  ;;  %v1537_v63 = vsel %vm1534_vm11, %v1535_v19, %v1536_v16  ;;  %vm1544_vm4 = vcmp.lt.s32.totalorder %v1202_v55, 0  ;;  %vm1062_vm5 = vcmp.eq.s32.totalorder %v1945_v1, 0  ;;  %vm1125_vm11 = vcmask 1044484  }
 0x137   : > { %v1007_v47 = vrot.slane %v1006_v36, 4  ;;  %v2744_v43 = vpop.f32.mrf.mxu3  ;;  %v905_v49 = vmul.f32 1.442695, %v892_v37  ;;  %v909_v18 = vmul.f32 1.442695, %v894_v8  ;;  %1240 = vst.msk [vmem:[%s2673_s13 + $0x58] sm:$0xff] %vm1228_vm0, %v1543_v21  ;;  %v1547_v48 = vsel %vm1544_vm4, %v1545_v22, %v1546_v31 }
 0x138   : > { %v988_v45 = vmul.f32 %v2744_v43, %v2744_v43  ;;  %vm1126_vm4 = vsmask.f32 4352 }
 0x139   : > { %v1640_v3 = vpop.eup %1639  ;;  %v1008_v46 = vadd.f32 %v1007_v47, %v1006_v36  ;;  %1643 = vpow2.f32 %v905_v49  ;;  %v1208_v36 = vpop.xlane.xlu2 %1207 }
 0x13a   : > { %v1642_v58 = vpop.eup %1641  ;;  %v2752_v10 = vsel %vm830_vm12, %v1640_v3, 0.0  ;;  %v1017_v59 = vsel %vm869_vm3, %v988_v45, 0.0  ;;  %1645 = vpow2.f32 %v909_v18  ;;  %v1205_v47 = vpop.xlane.xlu1 %1204  ;;  %v1555_v49 = vceil.f32 %v1208_v36 }
 0x13b   : > { %v2757_v60 = vsel %vm837_vm9, %v1642_v58, 0.0  ;;  %v1009_v61 = vrot.slane %v1008_v46, 2  ;;  %v1018_v0 = vadd.f32 %v1017_v59, %v1016_v6  ;;  %v1538_v6 = vcvt.f32.s32 %v1537_v63  ;;  %v1211_v51 = vpop.xlane.xlu0 %1210 }
 0x13c   : > { %v939_v5 = vadd.f32 %v2757_v60, %v2752_v10  ;;  %vm1554_vm13 = vcmp.lt.s32.totalorder %v1208_v36, 0  ;;  %v1556_v52 = vfloor.f32 %v1208_v36  ;;  %vm1549_vm8 = vcmp.lt.s32.totalorder %v1205_v47, 0 }
 0x13d   : > { %v1010_v15 = vadd.f32 %v1009_v61, %v1008_v46  ;;  %v1019_v27 = vrot.slane %v1018_v0, 4  ;;  %1239 = vst.msk [vmem:[%s2673_s13 + $0x50] sm:$0xff] %vm1228_vm0, %v1538_v6  ;;  %v1548_v46 = vcvt.f32.s32 %v1547_v48  ;;  %v1550_v58 = vceil.f32 %v1205_v47 }
 0x13e   : > { %v945_v29 = vrot.slane %v939_v5, 4  ;;  %v1551_v59 = vfloor.f32 %v1205_v47  ;;  %vm1559_vm2 = vcmp.lt.s32.totalorder %v1211_v51, 0  ;;  %v1560_v55 = vceil.f32 %v1211_v51 }
 0x13f   : > { %v1011_v12 = vrot.slane %v1010_v15, 1  ;;  %v1020_v32 = vadd.f32 %v1019_v27, %v1018_v0  ;;  %v1644_v33 = vpop.eup %1643  ;;  %1241 = vst.msk [vmem:[%s2673_s13 + $0x60] sm:$0xff] %vm1228_vm0, %v1548_v46  ;;  %v1557_v0 = vsel %vm1554_vm13, %v1555_v49, %v1556_v52  ;;  %v1561_v27 = vfloor.f32 %v1211_v51 }
 0x140   : > { %v946_v34 = vadd.f32 %v945_v29, %v939_v5  ;;  %v1646_v23 = vpop.eup %1645  ;;  %v2768_v24 = vsel %vm830_vm12, %v1644_v33, 0.0  ;;  %v1558_v13 = vcvt.f32.s32 %v1557_v0  ;;  %v1552_v14 = vsel %vm1549_vm8, %v1550_v58, %v1551_v59  ;;  %v1655_v29 = vld [vmem:[%s250_s24] sm:$0xff] }
 0x141   : > { %v1012_v39 = vadd.f32 %v1011_v12, %v1010_v15  ;;  %v1021_v35 = vrot.slane %v1020_v32, 2  ;;  %v2774_v37 = vsel %vm837_vm9, %v1646_v23, 0.0  ;;  %v1553_v15 = vcvt.f32.s32 %v1552_v14 }
 0x142   : > { %v947_v9 = vrot.slane %v946_v34, 2  ;;  %v951_v8 = vadd.f32 %v2774_v37, %v2768_v24  ;;  %vm1059_vm15 = vcmp.ne.s32.totalorder %v1655_v29, 4294967295  ;;  %1243 = vst.msk [vmem:[%s2673_s13 + $0x70] sm:$0xff] %vm1228_vm0, %v1558_v13  ;;  %v1562_v16 = vsel %vm1559_vm2, %v1560_v55, %v1561_v27 }
 0x143   : > { %v1025_v38 = vmax.f32 %v1012_v39, 1e-24  ;;  %v1022_v40 = vadd.f32 %v1021_v35, %v1020_v32  ;;  %1242 = vst.msk [vmem:[%s2673_s13 + $0x68] sm:$0xff] %vm1228_vm0, %v1553_v15  ;;  %v1563_v32 = vcvt.f32.s32 %v1562_v16  ;;  %v1458_v21 = vsel %vm1059_vm15, 1.0, %v1809_v54 }
 0x144   : > { %v948_v2 = vadd.f32 %v947_v9, %v946_v34  ;;  %v957_v18 = vrot.slane %v951_v8, 4  ;;  %v1093_v23 = vperm.slane %v1458_v21, 0  ;;  %v1094_v9 = vperm.slane %v1458_v21, 4 }
 0x145   : > { %1647 = vrsqrt.f32 %v1025_v38  ;;  %v1023_v45 = vrot.slane %v1022_v40, 1  ;;  %1244 = vst.msk [vmem:[%s2673_s13 + $0x78] sm:$0xff] %vm1228_vm0, %v1563_v32  ;;  %vm1033_vm10 = vweird.f32 %v1025_v38  ;;  %vm1123_vm0 = vsmask.f32 256 }
 0x146   : > { %v949_v3 = vrot.slane %v948_v2, 1  ;;  %v958_v62 = vadd.f32 %v957_v18, %v951_v8  ;;  %v1097_v54 = vperm.slane %v1093_v23, 0  ;;  %vm2807_vm8 = vmand %vm869_vm3, %vm1123_vm0 }
 0x147   : > { %v1024_v56 = vadd.f32 %v1023_v45, %v1022_v40  ;;  %vm2825_vm3 = vmand %vm1125_vm11, %vm1126_vm4 }
 0x148   : > { %v950_v61 = vadd.f32 %v949_v3, %v948_v2  ;;  %v959_v5 = vrot.slane %v958_v62, 2  ;;  %vm1128_vm2 = vmor %vm2825_vm3, %vm2807_vm8 }
 0x149   : > { %v1026_v44 = vmax.f32 %v1024_v56, 1e-24 }
 0x14a   : > { %1649 = vrcp.f32 %v950_v61  ;;  %v960_v30 = vadd.f32 %v959_v5, %v958_v62 }
 0x14b   : > { %v1648_v28 = vpop.eup %1647  ;;  %1651 = vrsqrt.f32 %v1026_v44  ;;  %vm1043_vm13 = vweird.f32 %v1026_v44 }
 0x14c   : > { %v1028_v19 = vmul.f32 %v1648_v28, %v1025_v38  ;;  %v961_v12 = vrot.slane %v960_v30, 1  ;;  %vm1034_vm1 = vweird.f32 %v1648_v28 }
 0x14d   : > { %vm1035_vm6 = vmor %vm1033_vm10, %vm1034_vm1 }
 0x14e   : > { %v1029_v33 = vmul.f32 %v1648_v28, %v1028_v19  ;;  %v962_v34 = vadd.f32 %v961_v12, %v960_v30 }
 0x150   : > { %v1650_v63 = vpop.eup %1649  ;;  %v1030_v22 = vmul.f32 0.5, %v1029_v33  ;;  %1653 = vrcp.f32 %v962_v34 }
 0x151   : > { %v1652_v31 = vpop.eup %1651  ;;  %v965_v39 = vmul.f32 %v1650_v63, %v2752_v10  ;;  %v1098_v10 = vperm.slane %v1094_v9, 0  ;;  %v967_v51 = vmul.f32 %v1650_v63, %v2757_v60 }
 0x152   : > { %v1031_v35 = vsub.f32 1.5, %v1030_v22  ;;  %v1038_v36 = vmul.f32 %v1652_v31, %v1026_v44  ;;  %vm1044_vm14 = vweird.f32 %v1652_v31 }
 0x153   : > { %v1080_v6 = vsel %vm830_vm12, %v965_v39, %v2658_v7 }
 0x154   : > { %v1032_v8 = vmul.f32 %v1648_v28, %v1031_v35  ;;  %v1039_v40 = vmul.f32 %v1652_v31, %v1038_v36  ;;  %v1099_v45 = vsel %vm1062_vm5, %v1097_v54, %v1080_v6 }
 0x156   : > { %v1036_v47 = vsel %vm1035_vm6, %v1648_v28, %v1032_v8  ;;  %v1040_v2 = vmul.f32 0.5, %v1039_v40  ;;  %v1654_v48 = vpop.eup %1653 }
 0x157   : > { %v1049_v49 = vmul.f32 %v1036_v47, %v2678_v57  ;;  %v966_v18 = vmul.f32 %v1654_v48, %v2768_v24  ;;  %v1051_v52 = vmul.f32 %v1036_v47, %v2668_v53  ;;  %v1053_v62 = vmul.f32 %v1036_v47, %v2690_v17 }
 0x158   : > { %v1041_v38 = vsub.f32 1.5, %v1040_v2  ;;  %v1055_v56 = vmul.f32 %v1036_v47, %v2706_v42  ;;  %v1057_v58 = vmul.f32 %v1036_v47, %v2731_v20  ;;  %v968_v0 = vmul.f32 %v1654_v48, %v2774_v37 }
 0x159   : > { %v1081_v7 = vsel %vm830_vm12, %v966_v18, %v2666_v50  ;;  %v1070_v60 = vsel %vm849_vm7, %v1049_v49, %v2678_v57  ;;  %vm1045_vm12 = vmor %vm1043_vm13, %vm1044_vm14 }
 0x15a   : > { %v1042_v3 = vmul.f32 %v1652_v31, %v1041_v38  ;;  %v1100_v24 = vsel %vm1062_vm5, %v1098_v10, %v1081_v7  ;;  %v1082_v42 = vsel %vm837_vm9, %v967_v51, %v1070_v60 }
 0x15b   : > { %v1111_v50 = vpack.c.bf16 %v1100_v24, %v1099_v45 }
 0x15c   : > { %v1046_v1 = vsel %vm1045_vm12, %v1652_v31, %v1042_v3 }
 0x15d   : > { %v1050_v17 = vmul.f32 %v1046_v1, %v2688_v26  ;;  %v1052_v57 = vmul.f32 %v1046_v1, %v2686_v4  ;;  %v1054_v59 = vmul.f32 %v1046_v1, %v2700_v25  ;;  %v1056_v61 = vmul.f32 %v1046_v1, %v2727_v11  ;;  %1117 = vst [vmem:[%s319_s27] sm:$0xff] %v1111_v50  ;;  %v1129_v4 = vld [vmem:[%s319_s27 + $0x28] sm:$0x11] }
 0x15e   : > { %v1058_v20 = vmul.f32 %v1046_v1, %v2744_v43 }
 0x15f   : > { %v1071_v55 = vsel %vm849_vm7, %v1050_v17, %v2688_v26  ;;  %v1113_v5 = vpack.c.bf16 %v1052_v57, %v1051_v52  ;;  %v1114_v44 = vpack.c.bf16 %v1054_v59, %v1053_v62  ;;  %v1115_v11 = vpack.c.bf16 %v1056_v61, %v1055_v56 }
 0x160   : > { %v1083_v25 = vsel %vm837_vm9, %v968_v0, %v1071_v55  ;;  %v1116_v37 = vpack.c.bf16 %v1058_v20, %v1057_v58 }
 0x161   : > { %v1112_v13 = vpack.c.bf16 %v1083_v25, %v1082_v42  ;;  %1119 = vst [vmem:[%s319_s27 + $0x10] sm:$0xff] %v1113_v5 }
 0x162   : > { %1120 = vst [vmem:[%s319_s27 + $0x18] sm:$0xff] %v1114_v44  ;;  %v1130_v43 = vsel %vm1128_vm2, %v1116_v37, %v1129_v4 }
 0x163   : > { %1118 = vst [vmem:[%s319_s27 + $0x8] sm:$0xff] %v1112_v13 }
 0x164   : > { %1121 = vst [vmem:[%s319_s27 + $0x20] sm:$0xff] %v1115_v11 }
 0x165   : > { %1131 = vst [vmem:[%s319_s27 + $0x28] sm:$0x11] %v1130_v43 }
 0x166 PF: > { %s21_s20 = sadd.s32 1, %s1804_s20   ;;  %s2925_s28 = sld [smem:[#allocation10_spill]] }
 0x167   : > { %p18_p2 = scmp.ge.s32.totalorder %s21_s20, 4   ;;  %s2926_s15 = smov %s1788_s16 }
 0x168   : > { %s2927_s16 = smov %s1792_s17  ;;  %s2928_s17 = smov %s1911_s12 }
 0x169   : > { %s2929_s18 = smov %s1800_s19  ;;  %20 = sbr.rel (!%p18_p2) target bundleno = 8 (0x8), region = 101 }
 0x16c   : > { %s2930_s19 = smov %s2925_s28 }
 0x16e   :  { %1299 = vsyncpa [#allocation3], 1 }
 0x16f   :  { %1301 = vsyncpa [#allocation3 + $0x1], 1 }
 0x170   :  { %1302 = vsyncpa [#allocation5], 1 }
 0x171   :  { %1304 = vsyncpa [#allocation5 + $0x1], 1 }

</bundles_post_ra>
